<compile_context>
chip_gen: v5e
topology: v5e:2x2
jax: 0.10.0
libtpu: 0.0.40
codegen_flags: <defaults>
</compile_context>

<pallas_src>
import functools
import math
from typing import NamedTuple, Optional

import jax
import jax.numpy as jnp
from jax.experimental import pallas as pl
from jax.experimental.pallas import tpu as pltpu

LN_EPS = 1e-12
_LANE = 128
_SUBLANE = 8


def _round_up(x, m):
    return -(-x // m) * m


def _vmem_budget_bytes():
    """Scoped-VMEM budget: physical capacity minus headroom for compiler temps."""
    try:
        cap = int(pltpu.get_tpu_info().vmem_capacity_bytes)
    except Exception:
        cap = 128 * 1024 * 1024
    return max(32 * 1024 * 1024, min(cap - 8 * 1024 * 1024, int(cap * 0.85)))


def _choose_tiles(h_pad, i_pad128, *, budget, block_m, block_i):
    """Pick the I-chunk width and the per-row VMEM budget for the M tile."""
    # Per M-row VMEM bytes: input (2x f32) + output (2x f32) + scratch
    # (bf16 x_s + bf16 r + f32 vacc) + slack for prologue f32 temporaries.
    per_row = 34 * h_pad
    wr_bytes = 2 * h_pad * h_pad                 # bf16 Wr, single-buffered
    ti = min(_round_up(block_i, _LANE), i_pad128)
    while True:
        fixed = wr_bytes + 8 * h_pad * ti + (2 << 20)
        tm_rows = max(0, budget - fixed) // per_row
        if tm_rows >= min(block_m, 256) or ti <= _LANE:
            break
        ti = max(_LANE, _round_up(ti // 2, _LANE))
    return ti, int(tm_rows)


class ChannelMixerParams(NamedTuple):
    gamma2d: jax.Array   # (1, h_pad) f32
    beta2d: jax.Array    # (1, h_pad) f32
    wk: jax.Array        # (h_pad, i_pad) bf16
    wv: jax.Array        # (i_pad, h_pad) bf16
    wr: jax.Array        # (h_pad, h_pad) bf16
    h: int               # actual hidden size
    h_pad: int
    i_pad: int
    ti: int
    tm_budget: int
    vmem_limit: int


def prepare_channel_mixer_params(gamma, beta, wk, wv, wr, *, block_m=512,
                                 block_i: Optional[int] = None):
    """One-time cast/pad of the weights (hoisted out of the per-call hot path)."""
    H, I = wk.shape
    h_pad = _round_up(H, _LANE)
    i_pad128 = _round_up(I, _LANE)

    budget = _vmem_budget_bytes()
    if block_i is None:
        # Larger weight DMAs where VMEM allows (v5e/v6e 128 MiB parts).
        block_i = 1024 if budget >= 100 * 1024 * 1024 else 512
    ti, tm_budget = _choose_tiles(h_pad, i_pad128, budget=budget,
                                  block_m=block_m, block_i=block_i)
    i_pad = _round_up(I, ti)

    wk_b = jnp.pad(wk.astype(jnp.bfloat16), ((0, h_pad - H), (0, i_pad - I)))
    wv_b = jnp.pad(wv.astype(jnp.bfloat16), ((0, i_pad - I), (0, h_pad - H)))
    wr_b = jnp.pad(wr.astype(jnp.bfloat16), ((0, h_pad - H), (0, h_pad - H)))
    gamma2d = jnp.pad(gamma.astype(jnp.float32).reshape(1, H),
                      ((0, 0), (0, h_pad - H)))
    beta2d = jnp.pad(beta.astype(jnp.float32).reshape(1, H),
                     ((0, 0), (0, h_pad - H)))

    return ChannelMixerParams(gamma2d, beta2d, wk_b, wv_b, wr_b,
                              H, h_pad, i_pad, ti, tm_budget, budget)


def _channel_mixer_kernel(seq_len, h_actual, x_ref, gamma_ref, beta_ref,
                          wk_ref, wv_ref, wr_ref, o_ref,
                          xs_sc, r_sc, vacc_sc):
    """Grid: (m_tiles, i_chunks); i (intermediate-dim chunks) is the inner axis.

    x_ref      : (tm, h_pad)   input rows (flattened batch*seq)
    gamma/beta : (1, h_pad)    LayerNorm params (f32, zero-padded)
    wk_ref     : (h_pad, ti)   bf16 key-weight chunk
    wv_ref     : (ti, h_pad)   bf16 value-weight chunk
    wr_ref     : (h_pad,h_pad) bf16 receptance weight (resident, single-buffered)
    o_ref      : (tm, h_pad)   output rows
    xs_sc      : (tm, h_pad)   bf16 shifted LayerNorm output (MXU operand)
    r_sc       : (tm, h_pad)   bf16 sigmoid gate
    vacc_sc    : (tm, h_pad)   f32  value accumulator over I chunks
    """
    i = pl.program_id(1)

    @pl.when(i == 0)
    def _prologue():
        x = x_ref[...].astype(jnp.float32)                       # (tm, h_pad)

        # --- LayerNorm over the *actual* hidden dim (padded cols are zero) ---
        inv_h = 1.0 / h_actual
        mean = jnp.sum(x, axis=-1, keepdims=True) * inv_h
        xc = x - mean
        if x.shape[-1] != h_actual:       # hidden dim padded for lane density
            col = jax.lax.broadcasted_iota(jnp.int32, (1, x.shape[-1]), 1)
            xc = jnp.where(col < h_actual, xc, 0.0)
        var = jnp.sum(xc * xc, axis=-1, keepdims=True) * inv_h
        x_ln = xc * jax.lax.rsqrt(var + LN_EPS) * gamma_ref[...] + beta_ref[...]

        # --- receptance gate: sigmoid(x_ln @ Wr); bf16 MXU, f32 accum, bf16 store
        r_sc[...] = jax.nn.sigmoid(
            jnp.dot(x_ln.astype(jnp.bfloat16), wr_ref[...],
                    preferred_element_type=jnp.float32)).astype(jnp.bfloat16)

        # --- time shift: rotate rows down by one (XLU) and zero every sequence
        #     start.  tm is a multiple of seq_len, so the (tm,1) mask is
        #     tile-local and also kills cross-batch / cyclic-wrap leakage. ---
        x_s = pltpu.roll(x_ln, 1, 0)
        row = jax.lax.broadcasted_iota(jnp.int32, (x_s.shape[0], 1), 0)
        x_s = jnp.where((row % seq_len) == 0, 0.0, x_s)
        xs_sc[...] = x_s.astype(jnp.bfloat16)

        vacc_sc[...] = jnp.zeros_like(vacc_sc)

    # --- key/value path for this I chunk: v += square(relu(x_s @ Wk_i)) @ Wv_i
    k = jnp.dot(xs_sc[...], wk_ref[...], preferred_element_type=jnp.float32)
    k = jnp.square(jnp.maximum(k, 0.0))
    vacc_sc[...] += jnp.dot(k.astype(jnp.bfloat16), wv_ref[...],
                            preferred_element_type=jnp.float32)

    @pl.when(i == pl.num_programs(1) - 1)
    def _epilogue():
        o_ref[...] = (r_sc[...].astype(jnp.float32)
                      * vacc_sc[...]).astype(o_ref.dtype)


def rwkv_channel_mixer(x, params: ChannelMixerParams, *, block_m=512):
    """x: [B, T, H]; params from prepare_channel_mixer_params().

    Returns (out [B, T, H], new_state=None)  (track_channel_state=False).
    """
    B, T, H = x.shape
    assert H == params.h, "hidden size mismatch with prepared params"
    h_pad, i_pad, ti = params.h_pad, params.i_pad, params.ti
    M = B * T

    # --- M (row) tile: multiple of lcm(T, 8) so the shift mask stays tile-local,
    #     capped by block_m and the VMEM budget; keep >= 2 m-tiles where M
    #     allows (the "parallel" m axis feeds both v7x TensorCores).
    tm_unit = (T * _SUBLANE) // math.gcd(T, _SUBLANE)          # lcm(T, 8)
    tm = max(tm_unit, (min(block_m, params.tm_budget) // tm_unit) * tm_unit)
    if M > tm_unit:
        tm = min(tm, max(tm_unit, (M // (2 * tm_unit)) * tm_unit))
    tm = min(tm, _round_up(M, tm_unit))
    m_pad = _round_up(M, tm)
    m_tiles = m_pad // tm
    num_i = i_pad // ti

    x2 = x.reshape(M, H)
    if m_pad != M or h_pad != H:
        x2 = jnp.pad(x2, ((0, m_pad - M), (0, h_pad - H)))

    # Serpentine the i axis on odd m-tiles so the last Wk/Wv chunk of one
    # m-tile is reused as the first chunk of the next (integer-only index math).
    def _i_idx(m, i):
        parity = m % 2
        return parity * (num_i - 1 - i) + (1 - parity) * i

    cost = pl.CostEstimate(
        flops=2 * M * (H * i_pad + i_pad * H + H * H),
        transcendentals=M * H,  # sigmoid
        bytes_accessed=int(
            x2.size * x2.dtype.itemsize                      # input rows
            + m_pad * h_pad * x.dtype.itemsize               # output rows
            + m_tiles * (params.wk.size + params.wv.size) * 2  # re-streamed per m-tile
            + params.wr.size * 2),                           # fetched once
    )

    kernel = functools.partial(_channel_mixer_kernel, T, H)

    def build(single_buffer_consts):
        const_kw = ({"pipeline_mode": pl.Buffered(1)}
                    if single_buffer_consts else {})
        grid_spec = pltpu.PrefetchScalarGridSpec(
            num_scalar_prefetch=0,
            grid=(m_tiles, num_i),
            in_specs=[
                pl.BlockSpec((tm, h_pad), lambda m, i: (m, 0)),           # x rows
                pl.BlockSpec((1, h_pad), lambda m, i: (0, 0), **const_kw),  # gamma
                pl.BlockSpec((1, h_pad), lambda m, i: (0, 0), **const_kw),  # beta
                pl.BlockSpec((h_pad, ti), lambda m, i: (0, _i_idx(m, i))),  # Wk chunk
                pl.BlockSpec((ti, h_pad), lambda m, i: (_i_idx(m, i), 0)),  # Wv chunk
                pl.BlockSpec((h_pad, h_pad), lambda m, i: (0, 0), **const_kw),  # Wr
            ],
            out_specs=pl.BlockSpec((tm, h_pad), lambda m, i: (m, 0)),
            scratch_shapes=[
                pltpu.VMEM((tm, h_pad), jnp.bfloat16),   # shifted LN (MXU operand)
                pltpu.VMEM((tm, h_pad), jnp.bfloat16),   # receptance gate
                pltpu.VMEM((tm, h_pad), jnp.float32),    # value accumulator
            ],
        )
        return pl.pallas_call(
            kernel,
            out_shape=jax.ShapeDtypeStruct((m_pad, h_pad), x.dtype),
            grid_spec=grid_spec,
            compiler_params=pltpu.CompilerParams(
                dimension_semantics=("parallel", "arbitrary"),
                vmem_limit_bytes=params.vmem_limit,
            ),
            cost_estimate=cost,
        )

    args = (x2, params.gamma2d, params.beta2d, params.wk, params.wv, params.wr)
    try:
        out = build(True)(*args)
    except Exception:
        # TODO(synk): drop this fallback once pipeline_mode=pl.Buffered(1) on
        #             constant-index weight blocks is confirmed everywhere.
        out = build(False)(*args)

    out = out[:M, :H].reshape(B, T, H)
    new_state = None  # track_channel_state=False in the default config
    return out, new_state


def _reference(x, gamma, beta, wk, wv, wr):
    """Pure-JAX f32 reference (matches the PyTorch module)."""
    mean = jnp.mean(x, axis=-1, keepdims=True)
    var = jnp.mean((x - mean) ** 2, axis=-1, keepdims=True)
    x_ln = (x - mean) * jax.lax.rsqrt(var + LN_EPS) * gamma + beta
    x_s = jnp.concatenate(
        [jnp.zeros_like(x_ln[:, :1, :]), x_ln[:, :-1, :]], axis=1)
    k = jnp.square(jnp.maximum(
        jnp.einsum("bth,hi->bti", x_s, wk,
                   preferred_element_type=jnp.float32), 0.0))
    v = jnp.einsum("bti,ih->bth", k, wv, preferred_element_type=jnp.float32)
    r = jax.nn.sigmoid(jnp.einsum("bth,hg->btg", x_ln, wr,
                                  preferred_element_type=jnp.float32))
    return r * v


if __name__ == "__main__":
    # Small shapes consistent with the module: hidden=32, intermediate=4*32=128.
    B, T, H = 2, 8, 32
    I = 4 * H

    key = jax.random.PRNGKey(0)
    kx, kk, kv, kr = jax.random.split(key, 4)

    x = jax.random.normal(kx, (B, T, H), dtype=jnp.float32)

    # Deterministic parameter init (PyTorch Linear-style uniform, stored [in, out]).
    wk = jax.random.uniform(kk, (H, I), minval=-1.0, maxval=1.0) / jnp.sqrt(H)
    wv = jax.random.uniform(kv, (I, H), minval=-1.0, maxval=1.0) / jnp.sqrt(I)
    wr = jax.random.uniform(kr, (H, H), minval=-1.0, maxval=1.0) / jnp.sqrt(H)
    gamma = jnp.ones((H,), dtype=jnp.float32)   # LayerNorm weight
    beta = jnp.zeros((H,), dtype=jnp.float32)   # LayerNorm bias

    # One-time weight preparation (cast/pad hoisted out of the hot path).
    params = prepare_channel_mixer_params(gamma, beta, wk, wv, wr)

    out, new_state = rwkv_channel_mixer(x, params)
    out = jax.block_until_ready(out)

    ref = _reference(x, gamma, beta, wk, wv, wr)
    assert out.shape == (B, T, H)
    assert new_state is None
    # bf16 MXU operands / bf16 gate with f32 accumulation -> loosened tolerance.
    assert jnp.allclose(out, ref, atol=3e-2, rtol=3e-2), "mismatch vs reference"

    print("KERNEL_OK")
</pallas_src>

<mosaic_0001>
module attributes {stable_mosaic.version = 11 : i64} {
  func.func @_channel_mixer_kernel(%arg0: i32, %arg1: i32, %arg2: memref<8x128xf32, #tpu.memory_space<vmem>>, %arg3: memref<1x128xf32, #tpu.memory_space<vmem>>, %arg4: memref<1x128xf32, #tpu.memory_space<vmem>>, %arg5: memref<128x128xbf16, #tpu.memory_space<vmem>>, %arg6: memref<128x128xbf16, #tpu.memory_space<vmem>>, %arg7: memref<128x128xbf16, #tpu.memory_space<vmem>>, %arg8: memref<8x128xf32, #tpu.memory_space<vmem>>, %arg9: memref<8x128xbf16, #tpu.memory_space<vmem>>, %arg10: memref<8x128xbf16, #tpu.memory_space<vmem>>, %arg11: memref<8x128xf32, #tpu.memory_space<vmem>>) attributes {dimension_semantics = [#tpu.dimension_semantics<parallel>, #tpu.dimension_semantics<arbitrary>], iteration_bounds = array<i64: 2, 1>, scalar_prefetch = 0 : i64, scratch_operands = 3 : i64, tpu.core_type = #tpu.core_type<tc>, window_params = [{transform_indices = @transform_0, window_bounds = array<i64: 8, 128>}, {pipeline_mode = #tpu.pipeline_mode<synchronous>, transform_indices = @transform_1, window_bounds = array<i64: 1, 128>}, {pipeline_mode = #tpu.pipeline_mode<synchronous>, transform_indices = @transform_2, window_bounds = array<i64: 1, 128>}, {transform_indices = @transform_3, window_bounds = array<i64: 128, 128>}, {transform_indices = @transform_4, window_bounds = array<i64: 128, 128>}, {pipeline_mode = #tpu.pipeline_mode<synchronous>, transform_indices = @transform_5, window_bounds = array<i64: 128, 128>}, {transform_indices = @transform_6, window_bounds = array<i64: 8, 128>}]} {
    %c0_i32 = arith.constant 0 : i32
    %0 = arith.cmpi eq, %arg1, %c0_i32 : i32
    %1 = arith.extui %0 : i1 to i32
    %c0_i32_0 = arith.constant 0 : i32
    %2 = arith.cmpi ne, %1, %c0_i32_0 : i32
    scf.if %2 {
      %c0_14 = arith.constant 0 : index
      %c0_15 = arith.constant 0 : index
      %18 = vector.load %arg2[%c0_14, %c0_15] : memref<8x128xf32, #tpu.memory_space<vmem>>, vector<8x128xf32>
      %cst_16 = arith.constant dense<0.000000e+00> : vector<8xf32>
      %19 = vector.multi_reduction <add>, %18, %cst_16 [1] : vector<8x128xf32> to vector<8xf32>
      %20 = vector.shape_cast %19 : vector<8xf32> to vector<8x1xf32>
      %cst_17 = arith.constant 3.125000e-02 : f32
      %21 = vector.broadcast %cst_17 : f32 to vector<8x1xf32>
      %22 = arith.mulf %20, %21 : vector<8x1xf32>
      %23 = vector.broadcast %22 : vector<8x1xf32> to vector<8x128xf32>
      %24 = arith.subf %18, %23 : vector<8x128xf32>
      %25 = tpu.iota {dimensions = array<i32: 1>} : vector<1x128xi32>
      %c32_i32 = arith.constant 32 : i32
      %26 = vector.broadcast %c32_i32 : i32 to vector<1x128xi32>
      %27 = arith.cmpi slt, %25, %26 : vector<1x128xi32>
      %cst_18 = arith.constant 0.000000e+00 : f32
      %28 = vector.shape_cast %27 : vector<1x128xi1> to vector<1x128xi1>
      %29 = vector.broadcast %28 : vector<1x128xi1> to vector<8x128xi1>
      %30 = vector.broadcast %cst_18 : f32 to vector<8x128xf32>
      %31 = arith.select %29, %24, %30 : vector<8x128xi1>, vector<8x128xf32>
      %32 = arith.mulf %31, %31 : vector<8x128xf32>
      %cst_19 = arith.constant dense<0.000000e+00> : vector<8xf32>
      %33 = vector.multi_reduction <add>, %32, %cst_19 [1] : vector<8x128xf32> to vector<8xf32>
      %34 = vector.shape_cast %33 : vector<8xf32> to vector<8x1xf32>
      %cst_20 = arith.constant 3.125000e-02 : f32
      %35 = vector.broadcast %cst_20 : f32 to vector<8x1xf32>
      %36 = arith.mulf %34, %35 : vector<8x1xf32>
      %cst_21 = arith.constant 9.99999996E-13 : f32
      %37 = vector.broadcast %cst_21 : f32 to vector<8x1xf32>
      %38 = arith.addf %36, %37 : vector<8x1xf32>
      %39 = math.rsqrt %38 : vector<8x1xf32>
      %40 = vector.broadcast %39 : vector<8x1xf32> to vector<8x128xf32>
      %41 = arith.mulf %31, %40 : vector<8x128xf32>
      %c0_22 = arith.constant 0 : index
      %c0_23 = arith.constant 0 : index
      %42 = vector.load %arg3[%c0_22, %c0_23] : memref<1x128xf32, #tpu.memory_space<vmem>>, vector<1x128xf32>
      %43 = vector.broadcast %42 : vector<1x128xf32> to vector<8x128xf32>
      %44 = arith.mulf %41, %43 : vector<8x128xf32>
      %c0_24 = arith.constant 0 : index
      %c0_25 = arith.constant 0 : index
      %45 = vector.load %arg4[%c0_24, %c0_25] : memref<1x128xf32, #tpu.memory_space<vmem>>, vector<1x128xf32>
      %46 = vector.broadcast %45 : vector<1x128xf32> to vector<8x128xf32>
      %47 = arith.addf %44, %46 : vector<8x128xf32>
      %48 = arith.truncf %47 : vector<8x128xf32> to vector<8x128xbf16>
      %c0_26 = arith.constant 0 : index
      %c0_27 = arith.constant 0 : index
      %49 = vector.load %arg7[%c0_26, %c0_27] : memref<128x128xbf16, #tpu.memory_space<vmem>>, vector<128x128xbf16>
      %cst_28 = arith.constant dense<0.000000e+00> : vector<8x128xf32>
      %50 = tpu.matmul %48, %49, %cst_28 {dimension_numbers = #tpu.dot_dimension_numbers<[1], [0], [0], [1], [0, 0, 1, 1], [], []>} : vector<8x128xbf16>, vector<128x128xbf16>, vector<8x128xf32> -> vector<8x128xf32>
      %51 = arith.negf %50 : vector<8x128xf32>
      %52 = math.exp %51 : vector<8x128xf32>
      %cst_29 = arith.constant 1.000000e+00 : f32
      %53 = vector.broadcast %cst_29 : f32 to vector<8x128xf32>
      %54 = arith.addf %53, %52 : vector<8x128xf32>
      %55 = arith.divf %53, %54 : vector<8x128xf32>
      %56 = arith.truncf %55 : vector<8x128xf32> to vector<8x128xbf16>
      %c0_30 = arith.constant 0 : index
      %c0_31 = arith.constant 0 : index
      %57 = vector.load %arg10[%c0_30, %c0_31] : memref<8x128xbf16, #tpu.memory_space<vmem>>, vector<8x128xbf16>
      tpu.vector_store %arg10[%c0_30, %c0_31], %56 {strides = array<i32>} : memref<8x128xbf16, #tpu.memory_space<vmem>>, vector<8x128xbf16>,
      %c1_i32 = arith.constant 1 : i32
      %58 = tpu.dynamic_rotate %47 by %c1_i32 dim 0 : vector<8x128xf32>, i32 -> vector<8x128xf32>
      %59 = tpu.iota {dimensions = array<i32: 0>} : vector<8x1xi32>
      %c8_i32 = arith.constant 8 : i32
      %c0_i32_32 = arith.constant 0 : i32
      %60 = arith.cmpi eq, %c8_i32, %c0_i32_32 : i32
      %c1_i32_33 = arith.constant 1 : i32
      %61 = arith.select %60, %c1_i32_33, %c8_i32 : i32
      %62 = vector.broadcast %61 : i32 to vector<8x1xi32>
      %63 = arith.remsi %59, %62 : vector<8x1xi32>
      %c0_i32_34 = arith.constant 0 : i32
      %64 = vector.broadcast %c0_i32_34 : i32 to vector<8x1xi32>
      %65 = arith.cmpi ne, %63, %64 : vector<8x1xi32>
      %c0_i32_35 = arith.constant 0 : i32
      %66 = vector.broadcast %c0_i32_35 : i32 to vector<8x1xi32>
      %67 = arith.cmpi slt, %63, %66 : vector<8x1xi32>
      %c0_i32_36 = arith.constant 0 : i32
      %68 = arith.cmpi slt, %61, %c0_i32_36 : i32
      %69 = vector.broadcast %68 : i1 to vector<8x1xi1>
      %70 = vector.broadcast %69 : vector<8x1xi1> to vector<8x1xi1>
      %71 = arith.xori %67, %70 : vector<8x1xi1>
      %72 = arith.andi %71, %65 : vector<8x1xi1>
      %73 = vector.broadcast %61 : i32 to vector<8x1xi32>
      %74 = arith.addi %63, %73 : vector<8x1xi32>
      %75 = arith.select %72, %74, %63 : vector<8x1xi1>, vector<8x1xi32>
      %c0_i32_37 = arith.constant 0 : i32
      %76 = vector.broadcast %c0_i32_37 : i32 to vector<8x1xi32>
      %77 = arith.cmpi eq, %75, %76 : vector<8x1xi32>
      %cst_38 = arith.constant 0.000000e+00 : f32
      %78 = vector.shape_cast %77 : vector<8x1xi1> to vector<8x1xi1>
      %79 = vector.broadcast %78 : vector<8x1xi1> to vector<8x128xi1>
      %80 = vector.broadcast %cst_38 : f32 to vector<8x128xf32>
      %81 = arith.select %79, %80, %58 : vector<8x128xi1>, vector<8x128xf32>
      %82 = arith.truncf %81 : vector<8x128xf32> to vector<8x128xbf16>
      %c0_39 = arith.constant 0 : index
      %c0_40 = arith.constant 0 : index
      %83 = vector.load %arg9[%c0_39, %c0_40] : memref<8x128xbf16, #tpu.memory_space<vmem>>, vector<8x128xbf16>
      tpu.vector_store %arg9[%c0_39, %c0_40], %82 {strides = array<i32>} : memref<8x128xbf16, #tpu.memory_space<vmem>>, vector<8x128xbf16>,
      %cst_41 = arith.constant 0.000000e+00 : f32
      %84 = vector.broadcast %cst_41 : f32 to vector<8x128xf32>
      %c0_42 = arith.constant 0 : index
      %c0_43 = arith.constant 0 : index
      %85 = vector.load %arg11[%c0_42, %c0_43] : memref<8x128xf32, #tpu.memory_space<vmem>>, vector<8x128xf32>
      tpu.vector_store %arg11[%c0_42, %c0_43], %84 {strides = array<i32>} : memref<8x128xf32, #tpu.memory_space<vmem>>, vector<8x128xf32>,
    } else {
    }
    %c0 = arith.constant 0 : index
    %c0_1 = arith.constant 0 : index
    %3 = vector.load %arg9[%c0, %c0_1] : memref<8x128xbf16, #tpu.memory_space<vmem>>, vector<8x128xbf16>
    %c0_2 = arith.constant 0 : index
    %c0_3 = arith.constant 0 : index
    %4 = vector.load %arg5[%c0_2, %c0_3] : memref<128x128xbf16, #tpu.memory_space<vmem>>, vector<128x128xbf16>
    %cst = arith.constant dense<0.000000e+00> : vector<8x128xf32>
    %5 = tpu.matmul %3, %4, %cst {dimension_numbers = #tpu.dot_dimension_numbers<[1], [0], [0], [1], [0, 0, 1, 1], [], []>} : vector<8x128xbf16>, vector<128x128xbf16>, vector<8x128xf32> -> vector<8x128xf32>
    %cst_4 = arith.constant 0.000000e+00 : f32
    %6 = vector.broadcast %cst_4 : f32 to vector<8x128xf32>
    %7 = arith.maximumf %5, %6 : vector<8x128xf32>
    %8 = arith.mulf %7, %7 : vector<8x128xf32>
    %c0_5 = arith.constant 0 : index
    %c0_6 = arith.constant 0 : index
    %9 = vector.load %arg11[%c0_5, %c0_6] : memref<8x128xf32, #tpu.memory_space<vmem>>, vector<8x128xf32>
    %10 = arith.truncf %8 : vector<8x128xf32> to vector<8x128xbf16>
    %c0_7 = arith.constant 0 : index
    %c0_8 = arith.constant 0 : index
    %11 = vector.load %arg6[%c0_7, %c0_8] : memref<128x128xbf16, #tpu.memory_space<vmem>>, vector<128x128xbf16>
    %cst_9 = arith.constant dense<0.000000e+00> : vector<8x128xf32>
    %12 = tpu.matmul %10, %11, %cst_9 {dimension_numbers = #tpu.dot_dimension_numbers<[1], [0], [0], [1], [0, 0, 1, 1], [], []>} : vector<8x128xbf16>, vector<128x128xbf16>, vector<8x128xf32> -> vector<8x128xf32>
    %13 = arith.addf %9, %12 : vector<8x128xf32>
    %c0_10 = arith.constant 0 : index
    %c0_11 = arith.constant 0 : index
    %14 = vector.load %arg11[%c0_10, %c0_11] : memref<8x128xf32, #tpu.memory_space<vmem>>, vector<8x128xf32>
    tpu.vector_store %arg11[%c0_10, %c0_11], %13 {strides = array<i32>} : memref<8x128xf32, #tpu.memory_space<vmem>>, vector<8x128xf32>,
    %c0_i32_12 = arith.constant 0 : i32
    %15 = arith.cmpi eq, %arg1, %c0_i32_12 : i32
    %16 = arith.extui %15 : i1 to i32
    %c0_i32_13 = arith.constant 0 : i32
    %17 = arith.cmpi ne, %16, %c0_i32_13 : i32
    scf.if %17 {
      %c0_14 = arith.constant 0 : index
      %c0_15 = arith.constant 0 : index
      %18 = vector.load %arg10[%c0_14, %c0_15] : memref<8x128xbf16, #tpu.memory_space<vmem>>, vector<8x128xbf16>
      %19 = arith.extf %18 : vector<8x128xbf16> to vector<8x128xf32>
      %c0_16 = arith.constant 0 : index
      %c0_17 = arith.constant 0 : index
      %20 = vector.load %arg11[%c0_16, %c0_17] : memref<8x128xf32, #tpu.memory_space<vmem>>, vector<8x128xf32>
      %21 = arith.mulf %19, %20 : vector<8x128xf32>
      %c0_18 = arith.constant 0 : index
      %c0_19 = arith.constant 0 : index
      %22 = vector.load %arg8[%c0_18, %c0_19] : memref<8x128xf32, #tpu.memory_space<vmem>>, vector<8x128xf32>
      tpu.vector_store %arg8[%c0_18, %c0_19], %21 {strides = array<i32>} : memref<8x128xf32, #tpu.memory_space<vmem>>, vector<8x128xf32>,
    } else {
    }
    return
  }
  func.func @transform_0(%arg0: i32, %arg1: i32) -> (i32, i32) {
    %c0_i32 = arith.constant 0 : i32
    %c0_i32_0 = arith.constant 0 : i32
    return %arg0, %c0_i32 : i32, i32
  }
  func.func @transform_1(%arg0: i32, %arg1: i32) -> (i32, i32) {
    %c0_i32 = arith.constant 0 : i32
    %c0_i32_0 = arith.constant 0 : i32
    %c0_i32_1 = arith.constant 0 : i32
    return %c0_i32, %c0_i32_0 : i32, i32
  }
  func.func @transform_2(%arg0: i32, %arg1: i32) -> (i32, i32) {
    %c0_i32 = arith.constant 0 : i32
    %c0_i32_0 = arith.constant 0 : i32
    %c0_i32_1 = arith.constant 0 : i32
    return %c0_i32, %c0_i32_0 : i32, i32
  }
  func.func @transform_3(%arg0: i32, %arg1: i32) -> (i32, i32) {
    %c2_i32 = arith.constant 2 : i32
    %c0_i32 = arith.constant 0 : i32
    %0 = arith.cmpi eq, %c2_i32, %c0_i32 : i32
    %c1_i32 = arith.constant 1 : i32
    %1 = arith.select %0, %c1_i32, %c2_i32 : i32
    %2 = arith.remsi %arg0, %1 : i32
    %c0_i32_0 = arith.constant 0 : i32
    %3 = arith.cmpi ne, %2, %c0_i32_0 : i32
    %c0_i32_1 = arith.constant 0 : i32
    %4 = arith.cmpi slt, %2, %c0_i32_1 : i32
    %c0_i32_2 = arith.constant 0 : i32
    %5 = arith.cmpi slt, %1, %c0_i32_2 : i32
    %6 = arith.xori %4, %5 : i1
    %7 = arith.andi %6, %3 : i1
    %8 = arith.addi %2, %1 : i32
    %9 = arith.select %7, %8, %2 : i32
    %c0_i32_3 = arith.constant 0 : i32
    %10 = arith.subi %c0_i32_3, %arg1 : i32
    %11 = arith.muli %9, %10 : i32
    %c1_i32_4 = arith.constant 1 : i32
    %12 = arith.subi %c1_i32_4, %9 : i32
    %13 = arith.muli %12, %arg1 : i32
    %14 = arith.addi %11, %13 : i32
    %c0_i32_5 = arith.constant 0 : i32
    %c0_i32_6 = arith.constant 0 : i32
    return %c0_i32_5, %14 : i32, i32
  }
  func.func @transform_4(%arg0: i32, %arg1: i32) -> (i32, i32) {
    %c2_i32 = arith.constant 2 : i32
    %c0_i32 = arith.constant 0 : i32
    %0 = arith.cmpi eq, %c2_i32, %c0_i32 : i32
    %c1_i32 = arith.constant 1 : i32
    %1 = arith.select %0, %c1_i32, %c2_i32 : i32
    %2 = arith.remsi %arg0, %1 : i32
    %c0_i32_0 = arith.constant 0 : i32
    %3 = arith.cmpi ne, %2, %c0_i32_0 : i32
    %c0_i32_1 = arith.constant 0 : i32
    %4 = arith.cmpi slt, %2, %c0_i32_1 : i32
    %c0_i32_2 = arith.constant 0 : i32
    %5 = arith.cmpi slt, %1, %c0_i32_2 : i32
    %6 = arith.xori %4, %5 : i1
    %7 = arith.andi %6, %3 : i1
    %8 = arith.addi %2, %1 : i32
    %9 = arith.select %7, %8, %2 : i32
    %c0_i32_3 = arith.constant 0 : i32
    %10 = arith.subi %c0_i32_3, %arg1 : i32
    %11 = arith.muli %9, %10 : i32
    %c1_i32_4 = arith.constant 1 : i32
    %12 = arith.subi %c1_i32_4, %9 : i32
    %13 = arith.muli %12, %arg1 : i32
    %14 = arith.addi %11, %13 : i32
    %c0_i32_5 = arith.constant 0 : i32
    %c0_i32_6 = arith.constant 0 : i32
    return %14, %c0_i32_5 : i32, i32
  }
  func.func @transform_5(%arg0: i32, %arg1: i32) -> (i32, i32) {
    %c0_i32 = arith.constant 0 : i32
    %c0_i32_0 = arith.constant 0 : i32
    %c0_i32_1 = arith.constant 0 : i32
    return %c0_i32, %c0_i32_0 : i32, i32
  }
  func.func @transform_6(%arg0: i32, %arg1: i32) -> (i32, i32) {
    %c0_i32 = arith.constant 0 : i32
    %c0_i32_0 = arith.constant 0 : i32
    return %arg0, %c0_i32 : i32, i32
  }
}

module attributes {stable_mosaic.version = 11 : i64} {
  func.func @_channel_mixer_kernel(%arg0: i32, %arg1: i32, %arg2: memref<8x128xf32, #tpu.memory_space<vmem>>, %arg3: memref<1x128xf32, #tpu.memory_space<vmem>>, %arg4: memref<1x128xf32, #tpu.memory_space<vmem>>, %arg5: memref<128x128xbf16, #tpu.memory_space<vmem>>, %arg6: memref<128x128xbf16, #tpu.memory_space<vmem>>, %arg7: memref<128x128xbf16, #tpu.memory_space<vmem>>, %arg8: memref<8x128xf32, #tpu.memory_space<vmem>>, %arg9: memref<8x128xbf16, #tpu.memory_space<vmem>>, %arg10: memref<8x128xbf16, #tpu.memory_space<vmem>>, %arg11: memref<8x128xf32, #tpu.memory_space<vmem>>) attributes {dimension_semantics = [#tpu.dimension_semantics<parallel>, #tpu.dimension_semantics<arbitrary>], iteration_bounds = array<i64: 2, 1>, scalar_prefetch = 0 : i64, scratch_operands = 3 : i64, tpu.core_type = #tpu.core_type<tc>, window_params = [{transform_indices = @transform_0, window_bounds = array<i64: 8, 128>}, {pipeline_mode = #tpu.pipeline_mode<synchronous>, transform_indices = @transform_1, window_bounds = array<i64: 1, 128>}, {pipeline_mode = #tpu.pipeline_mode<synchronous>, transform_indices = @transform_2, window_bounds = array<i64: 1, 128>}, {transform_indices = @transform_3, window_bounds = array<i64: 128, 128>}, {transform_indices = @transform_4, window_bounds = array<i64: 128, 128>}, {pipeline_mode = #tpu.pipeline_mode<synchronous>, transform_indices = @transform_5, window_bounds = array<i64: 128, 128>}, {transform_indices = @transform_6, window_bounds = array<i64: 8, 128>}]} {
    %c0_i32 = arith.constant 0 : i32
    %0 = arith.cmpi eq, %arg1, %c0_i32 : i32
    %1 = arith.extui %0 : i1 to i32
    %c0_i32_0 = arith.constant 0 : i32
    %2 = arith.cmpi ne, %1, %c0_i32_0 : i32
    scf.if %2 {
      %c0_14 = arith.constant 0 : index
      %c0_15 = arith.constant 0 : index
      %18 = vector.load %arg2[%c0_14, %c0_15] : memref<8x128xf32, #tpu.memory_space<vmem>>, vector<8x128xf32>
      %cst_16 = arith.constant dense<0.000000e+00> : vector<8xf32>
      %19 = vector.multi_reduction <add>, %18, %cst_16 [1] : vector<8x128xf32> to vector<8xf32>
      %20 = vector.shape_cast %19 : vector<8xf32> to vector<8x1xf32>
      %cst_17 = arith.constant 3.125000e-02 : f32
      %21 = vector.broadcast %cst_17 : f32 to vector<8x1xf32>
      %22 = arith.mulf %20, %21 : vector<8x1xf32>
      %23 = vector.broadcast %22 : vector<8x1xf32> to vector<8x128xf32>
      %24 = arith.subf %18, %23 : vector<8x128xf32>
      %25 = tpu.iota {dimensions = array<i32: 1>} : vector<1x128xi32>
      %c32_i32 = arith.constant 32 : i32
      %26 = vector.broadcast %c32_i32 : i32 to vector<1x128xi32>
      %27 = arith.cmpi slt, %25, %26 : vector<1x128xi32>
      %cst_18 = arith.constant 0.000000e+00 : f32
      %28 = vector.shape_cast %27 : vector<1x128xi1> to vector<1x128xi1>
      %29 = vector.broadcast %28 : vector<1x128xi1> to vector<8x128xi1>
      %30 = vector.broadcast %cst_18 : f32 to vector<8x128xf32>
      %31 = arith.select %29, %24, %30 : vector<8x128xi1>, vector<8x128xf32>
      %32 = arith.mulf %31, %31 : vector<8x128xf32>
      %cst_19 = arith.constant dense<0.000000e+00> : vector<8xf32>
      %33 = vector.multi_reduction <add>, %32, %cst_19 [1] : vector<8x128xf32> to vector<8xf32>
      %34 = vector.shape_cast %33 : vector<8xf32> to vector<8x1xf32>
      %cst_20 = arith.constant 3.125000e-02 : f32
      %35 = vector.broadcast %cst_20 : f32 to vector<8x1xf32>
      %36 = arith.mulf %34, %35 : vector<8x1xf32>
      %cst_21 = arith.constant 9.99999996E-13 : f32
      %37 = vector.broadcast %cst_21 : f32 to vector<8x1xf32>
      %38 = arith.addf %36, %37 : vector<8x1xf32>
      %39 = math.rsqrt %38 : vector<8x1xf32>
      %40 = vector.broadcast %39 : vector<8x1xf32> to vector<8x128xf32>
      %41 = arith.mulf %31, %40 : vector<8x128xf32>
      %c0_22 = arith.constant 0 : index
      %c0_23 = arith.constant 0 : index
      %42 = vector.load %arg3[%c0_22, %c0_23] : memref<1x128xf32, #tpu.memory_space<vmem>>, vector<1x128xf32>
      %43 = vector.broadcast %42 : vector<1x128xf32> to vector<8x128xf32>
      %44 = arith.mulf %41, %43 : vector<8x128xf32>
      %c0_24 = arith.constant 0 : index
      %c0_25 = arith.constant 0 : index
      %45 = vector.load %arg4[%c0_24, %c0_25] : memref<1x128xf32, #tpu.memory_space<vmem>>, vector<1x128xf32>
      %46 = vector.broadcast %45 : vector<1x128xf32> to vector<8x128xf32>
      %47 = arith.addf %44, %46 : vector<8x128xf32>
      %48 = arith.truncf %47 : vector<8x128xf32> to vector<8x128xbf16>
      %c0_26 = arith.constant 0 : index
      %c0_27 = arith.constant 0 : index
      %49 = vector.load %arg7[%c0_26, %c0_27] : memref<128x128xbf16, #tpu.memory_space<vmem>>, vector<128x128xbf16>
      %cst_28 = arith.constant dense<0.000000e+00> : vector<8x128xf32>
      %50 = tpu.matmul %48, %49, %cst_28 {dimension_numbers = #tpu.dot_dimension_numbers<[1], [0], [0], [1], [0, 0, 1, 1], [], []>} : vector<8x128xbf16>, vector<128x128xbf16>, vector<8x128xf32> -> vector<8x128xf32>
      %51 = arith.negf %50 : vector<8x128xf32>
      %52 = math.exp %51 : vector<8x128xf32>
      %cst_29 = arith.constant 1.000000e+00 : f32
      %53 = vector.broadcast %cst_29 : f32 to vector<8x128xf32>
      %54 = arith.addf %53, %52 : vector<8x128xf32>
      %55 = arith.divf %53, %54 : vector<8x128xf32>
      %56 = arith.truncf %55 : vector<8x128xf32> to vector<8x128xbf16>
      %c0_30 = arith.constant 0 : index
      %c0_31 = arith.constant 0 : index
      %57 = vector.load %arg10[%c0_30, %c0_31] : memref<8x128xbf16, #tpu.memory_space<vmem>>, vector<8x128xbf16>
      tpu.vector_store %arg10[%c0_30, %c0_31], %56 {strides = array<i32>} : memref<8x128xbf16, #tpu.memory_space<vmem>>, vector<8x128xbf16>,
      %c1_i32 = arith.constant 1 : i32
      %58 = tpu.dynamic_rotate %47 by %c1_i32 dim 0 : vector<8x128xf32>, i32 -> vector<8x128xf32>
      %59 = tpu.iota {dimensions = array<i32: 0>} : vector<8x1xi32>
      %c8_i32 = arith.constant 8 : i32
      %c0_i32_32 = arith.constant 0 : i32
      %60 = arith.cmpi eq, %c8_i32, %c0_i32_32 : i32
      %c1_i32_33 = arith.constant 1 : i32
      %61 = arith.select %60, %c1_i32_33, %c8_i32 : i32
      %62 = vector.broadcast %61 : i32 to vector<8x1xi32>
      %63 = arith.remsi %59, %62 : vector<8x1xi32>
      %c0_i32_34 = arith.constant 0 : i32
      %64 = vector.broadcast %c0_i32_34 : i32 to vector<8x1xi32>
      %65 = arith.cmpi ne, %63, %64 : vector<8x1xi32>
      %c0_i32_35 = arith.constant 0 : i32
      %66 = vector.broadcast %c0_i32_35 : i32 to vector<8x1xi32>
      %67 = arith.cmpi slt, %63, %66 : vector<8x1xi32>
      %c0_i32_36 = arith.constant 0 : i32
      %68 = arith.cmpi slt, %61, %c0_i32_36 : i32
      %69 = vector.broadcast %68 : i1 to vector<8x1xi1>
      %70 = vector.broadcast %69 : vector<8x1xi1> to vector<8x1xi1>
      %71 = arith.xori %67, %70 : vector<8x1xi1>
      %72 = arith.andi %71, %65 : vector<8x1xi1>
      %73 = vector.broadcast %61 : i32 to vector<8x1xi32>
      %74 = arith.addi %63, %73 : vector<8x1xi32>
      %75 = arith.select %72, %74, %63 : vector<8x1xi1>, vector<8x1xi32>
      %c0_i32_37 = arith.constant 0 : i32
      %76 = vector.broadcast %c0_i32_37 : i32 to vector<8x1xi32>
      %77 = arith.cmpi eq, %75, %76 : vector<8x1xi32>
      %cst_38 = arith.constant 0.000000e+00 : f32
      %78 = vector.shape_cast %77 : vector<8x1xi1> to vector<8x1xi1>
      %79 = vector.broadcast %78 : vector<8x1xi1> to vector<8x128xi1>
      %80 = vector.broadcast %cst_38 : f32 to vector<8x128xf32>
      %81 = arith.select %79, %80, %58 : vector<8x128xi1>, vector<8x128xf32>
      %82 = arith.truncf %81 : vector<8x128xf32> to vector<8x128xbf16>
      %c0_39 = arith.constant 0 : index
      %c0_40 = arith.constant 0 : index
      %83 = vector.load %arg9[%c0_39, %c0_40] : memref<8x128xbf16, #tpu.memory_space<vmem>>, vector<8x128xbf16>
      tpu.vector_store %arg9[%c0_39, %c0_40], %82 {strides = array<i32>} : memref<8x128xbf16, #tpu.memory_space<vmem>>, vector<8x128xbf16>,
      %cst_41 = arith.constant 0.000000e+00 : f32
      %84 = vector.broadcast %cst_41 : f32 to vector<8x128xf32>
      %c0_42 = arith.constant 0 : index
      %c0_43 = arith.constant 0 : index
      %85 = vector.load %arg11[%c0_42, %c0_43] : memref<8x128xf32, #tpu.memory_space<vmem>>, vector<8x128xf32>
      tpu.vector_store %arg11[%c0_42, %c0_43], %84 {strides = array<i32>} : memref<8x128xf32, #tpu.memory_space<vmem>>, vector<8x128xf32>,
    } else {
    }
    %c0 = arith.constant 0 : index
    %c0_1 = arith.constant 0 : index
    %3 = vector.load %arg9[%c0, %c0_1] : memref<8x128xbf16, #tpu.memory_space<vmem>>, vector<8x128xbf16>
    %c0_2 = arith.constant 0 : index
    %c0_3 = arith.constant 0 : index
    %4 = vector.load %arg5[%c0_2, %c0_3] : memref<128x128xbf16, #tpu.memory_space<vmem>>, vector<128x128xbf16>
    %cst = arith.constant dense<0.000000e+00> : vector<8x128xf32>
    %5 = tpu.matmul %3, %4, %cst {dimension_numbers = #tpu.dot_dimension_numbers<[1], [0], [0], [1], [0, 0, 1, 1], [], []>} : vector<8x128xbf16>, vector<128x128xbf16>, vector<8x128xf32> -> vector<8x128xf32>
    %cst_4 = arith.constant 0.000000e+00 : f32
    %6 = vector.broadcast %cst_4 : f32 to vector<8x128xf32>
    %7 = arith.maximumf %5, %6 : vector<8x128xf32>
    %8 = arith.mulf %7, %7 : vector<8x128xf32>
    %c0_5 = arith.constant 0 : index
    %c0_6 = arith.constant 0 : index
    %9 = vector.load %arg11[%c0_5, %c0_6] : memref<8x128xf32, #tpu.memory_space<vmem>>, vector<8x128xf32>
    %10 = arith.truncf %8 : vector<8x128xf32> to vector<8x128xbf16>
    %c0_7 = arith.constant 0 : index
    %c0_8 = arith.constant 0 : index
    %11 = vector.load %arg6[%c0_7, %c0_8] : memref<128x128xbf16, #tpu.memory_space<vmem>>, vector<128x128xbf16>
    %cst_9 = arith.constant dense<0.000000e+00> : vector<8x128xf32>
    %12 = tpu.matmul %10, %11, %cst_9 {dimension_numbers = #tpu.dot_dimension_numbers<[1], [0], [0], [1], [0, 0, 1, 1], [], []>} : vector<8x128xbf16>, vector<128x128xbf16>, vector<8x128xf32> -> vector<8x128xf32>
    %13 = arith.addf %9, %12 : vector<8x128xf32>
    %c0_10 = arith.constant 0 : index
    %c0_11 = arith.constant 0 : index
    %14 = vector.load %arg11[%c0_10, %c0_11] : memref<8x128xf32, #tpu.memory_space<vmem>>, vector<8x128xf32>
    tpu.vector_store %arg11[%c0_10, %c0_11], %13 {strides = array<i32>} : memref<8x128xf32, #tpu.memory_space<vmem>>, vector<8x128xf32>,
    %c0_i32_12 = arith.constant 0 : i32
    %15 = arith.cmpi eq, %arg1, %c0_i32_12 : i32
    %16 = arith.extui %15 : i1 to i32
    %c0_i32_13 = arith.constant 0 : i32
    %17 = arith.cmpi ne, %16, %c0_i32_13 : i32
    scf.if %17 {
      %c0_14 = arith.constant 0 : index
      %c0_15 = arith.constant 0 : index
      %18 = vector.load %arg10[%c0_14, %c0_15] : memref<8x128xbf16, #tpu.memory_space<vmem>>, vector<8x128xbf16>
      %19 = arith.extf %18 : vector<8x128xbf16> to vector<8x128xf32>
      %c0_16 = arith.constant 0 : index
      %c0_17 = arith.constant 0 : index
      %20 = vector.load %arg11[%c0_16, %c0_17] : memref<8x128xf32, #tpu.memory_space<vmem>>, vector<8x128xf32>
      %21 = arith.mulf %19, %20 : vector<8x128xf32>
      %c0_18 = arith.constant 0 : index
      %c0_19 = arith.constant 0 : index
      %22 = vector.load %arg8[%c0_18, %c0_19] : memref<8x128xf32, #tpu.memory_space<vmem>>, vector<8x128xf32>
      tpu.vector_store %arg8[%c0_18, %c0_19], %21 {strides = array<i32>} : memref<8x128xf32, #tpu.memory_space<vmem>>, vector<8x128xf32>,
    } else {
    }
    return
  }
  func.func @transform_0(%arg0: i32, %arg1: i32) -> (i32, i32) {
    %c0_i32 = arith.constant 0 : i32
    %c0_i32_0 = arith.constant 0 : i32
    return %arg0, %c0_i32 : i32, i32
  }
  func.func @transform_1(%arg0: i32, %arg1: i32) -> (i32, i32) {
    %c0_i32 = arith.constant 0 : i32
    %c0_i32_0 = arith.constant 0 : i32
    %c0_i32_1 = arith.constant 0 : i32
    return %c0_i32, %c0_i32_0 : i32, i32
  }
  func.func @transform_2(%arg0: i32, %arg1: i32) -> (i32, i32) {
    %c0_i32 = arith.constant 0 : i32
    %c0_i32_0 = arith.constant 0 : i32
    %c0_i32_1 = arith.constant 0 : i32
    return %c0_i32, %c0_i32_0 : i32, i32
  }
  func.func @transform_3(%arg0: i32, %arg1: i32) -> (i32, i32) {
    %c2_i32 = arith.constant 2 : i32
    %c0_i32 = arith.constant 0 : i32
    %0 = arith.cmpi eq, %c2_i32, %c0_i32 : i32
    %c1_i32 = arith.constant 1 : i32
    %1 = arith.select %0, %c1_i32, %c2_i32 : i32
    %2 = arith.remsi %arg0, %1 : i32
    %c0_i32_0 = arith.constant 0 : i32
    %3 = arith.cmpi ne, %2, %c0_i32_0 : i32
    %c0_i32_1 = arith.constant 0 : i32
    %4 = arith.cmpi slt, %2, %c0_i32_1 : i32
    %c0_i32_2 = arith.constant 0 : i32
    %5 = arith.cmpi slt, %1, %c0_i32_2 : i32
    %6 = arith.xori %4, %5 : i1
    %7 = arith.andi %6, %3 : i1
    %8 = arith.addi %2, %1 : i32
    %9 = arith.select %7, %8, %2 : i32
    %c0_i32_3 = arith.constant 0 : i32
    %10 = arith.subi %c0_i32_3, %arg1 : i32
    %11 = arith.muli %9, %10 : i32
    %c1_i32_4 = arith.constant 1 : i32
    %12 = arith.subi %c1_i32_4, %9 : i32
    %13 = arith.muli %12, %arg1 : i32
    %14 = arith.addi %11, %13 : i32
    %c0_i32_5 = arith.constant 0 : i32
    %c0_i32_6 = arith.constant 0 : i32
    return %c0_i32_5, %14 : i32, i32
  }
  func.func @transform_4(%arg0: i32, %arg1: i32) -> (i32, i32) {
    %c2_i32 = arith.constant 2 : i32
    %c0_i32 = arith.constant 0 : i32
    %0 = arith.cmpi eq, %c2_i32, %c0_i32 : i32
    %c1_i32 = arith.constant 1 : i32
    %1 = arith.select %0, %c1_i32, %c2_i32 : i32
    %2 = arith.remsi %arg0, %1 : i32
    %c0_i32_0 = arith.constant 0 : i32
    %3 = arith.cmpi ne, %2, %c0_i32_0 : i32
    %c0_i32_1 = arith.constant 0 : i32
    %4 = arith.cmpi slt, %2, %c0_i32_1 : i32
    %c0_i32_2 = arith.constant 0 : i32
    %5 = arith.cmpi slt, %1, %c0_i32_2 : i32
    %6 = arith.xori %4, %5 : i1
    %7 = arith.andi %6, %3 : i1
    %8 = arith.addi %2, %1 : i32
    %9 = arith.select %7, %8, %2 : i32
    %c0_i32_3 = arith.constant 0 : i32
    %10 = arith.subi %c0_i32_3, %arg1 : i32
    %11 = arith.muli %9, %10 : i32
    %c1_i32_4 = arith.constant 1 : i32
    %12 = arith.subi %c1_i32_4, %9 : i32
    %13 = arith.muli %12, %arg1 : i32
    %14 = arith.addi %11, %13 : i32
    %c0_i32_5 = arith.constant 0 : i32
    %c0_i32_6 = arith.constant 0 : i32
    return %14, %c0_i32_5 : i32, i32
  }
  func.func @transform_5(%arg0: i32, %arg1: i32) -> (i32, i32) {
    %c0_i32 = arith.constant 0 : i32
    %c0_i32_0 = arith.constant 0 : i32
    %c0_i32_1 = arith.constant 0 : i32
    return %c0_i32, %c0_i32_0 : i32, i32
  }
  func.func @transform_6(%arg0: i32, %arg1: i32) -> (i32, i32) {
    %c0_i32 = arith.constant 0 : i32
    %c0_i32_0 = arith.constant 0 : i32
    return %arg0, %c0_i32 : i32, i32
  }
}

</mosaic_0001>

<bundles_post_ra>
// kernel: tpu_custom_call.1
= control target key start
LH: loop header
LB: loop body
LE: loop exit
PB: predicated region body
PF: predicated region fallthrough
CT: control target
= control target key end

     0   :  { %s1775_s0 = inlined_call_operand.hbm [shape: f32[16,128], index: 0, kind: input, shape index: {}]   ;;  %s1776_s1 = inlined_call_operand.hbm [shape: f32[1,128], index: 1, kind: input, shape index: {}]   ;;  %s1777_s2 = inlined_call_operand.vmem [shape: f32[1,128], index: 2, kind: input, shape index: {}]   ;;  %s1778_s3 = inlined_call_operand.hbm [shape: bf16[128,128], index: 3, kind: input, shape index: {}]   ;;  %s1779_s4 = inlined_call_operand.hbm [shape: bf16[128,128], index: 4, kind: input, shape index: {}]   ;;  %s1780_s5 = inlined_call_operand.hbm [shape: bf16[128,128], index: 5, kind: input, shape index: {}]   ;;  %s1781_s6 = inlined_call_operand.hbm [shape: f32[16,128], index: 6, kind: output, shape index: {}]  }
   0x1   :  { %1785 = sst [smem:[#allocation23_spill]] %s1775_s0 }
   0x2   :  { %1786 = sst [smem:[#allocation24_spill]] %s1776_s1 }
   0x3   :  { %1787 = sst [smem:[#allocation25_spill]] %s1778_s3 }
   0x4   :  { %11 = vsyncpa [#allocation6], 0 }
   0x5   :  { %13 = vsyncpa [#allocation6 + $0x1], 0 }
   0x6   :  { %14 = vsyncpa [#allocation9], 0 }
   0x7   :  { %15 = vsyncpa [#allocation7], 0 }
   0x8   :  { %17 = vsyncpa [#allocation7 + $0x1], 0  ;;  %s1572_s21 = smov 0   ;;  %s1574_s22 = smov 0  }
   0x9   :  { %s1576_s23 = smov 0   ;;  %s1578_s24 = smov 0  }
   0xa   :  { %s1580_s25 = smov 0   ;;  %s1582_s26 = smov 0  }
   0xb LB: > { %1788 = sst [smem:[#allocation19_spill]] %s1517_s23  ;;  %s35_s27 = sadd.s32 1, %s1525_s25  ;;  %s1529_s26 = sphi %s1582_s26, %s23_s26   ;;  %s1525_s25 = sphi %s1580_s25, %s1805_s25   ;;  %s1521_s24 = sphi %s1578_s24, %s1804_s24   ;;  %s1517_s23 = sphi %s1576_s23, %s1803_s23   ;;  %s1513_s22 = sphi %s1574_s22, %s1807_s22   ;;  %s1509_s21 = sphi %s1572_s21, %s1806_s21  }
   0xc   : > { %1789 = sst [smem:[#allocation20_spill]] %s1525_s25  ;;  %s42_s28 = sadd.s32 1, %s1517_s23 }
   0xd   : > { %p37_p0 = scmp.ge.s32.totalorder %s35_s27, 2  ;;  %p49_p1 = scmp.ne.s32.totalorder %s1517_s23, %s1513_s22 }
   0xe   : > { %p50_p2 = scmp.eq.s32.totalorder %s1529_s26, 0  ;;  %p1029_p3 = scmp.ge.s32.totalorder %s1529_s26, 2 }
   0xf   : > { %s1809_s27 = smov (%p37_p0, %s35_s27), 0  ;;  %p1215_p5 = scmp.lt.s32.totalorder %s1529_s26, 2 }
  0x10   : > { %1790 = sst [smem:[#allocation21_spill]] %s1809_s27  ;;  %p1615_p4 = por %p50_p2, %p49_p1 }
  0x11   : > { %s39_s30 = ssub.s32 %s1525_s25, %s1809_s27  ;;  %s317_s7 = sand.u32 1, %s1529_s26  }
  0x12   : > { %p40_p6 = scmp.eq.s32.totalorder %s39_s30, 0  ;;  %s319_s8 = sand.u32 1, %s1517_s23  }
  0x13   : > { %s1031_s9 = sshll.u32 %s1525_s25, 3  ;;  %s1030_s11 = sshll.u32 %s319_s8, 3 }
  0x14   : > { %s1626_s10 = scalar_select %p40_p6, %s1517_s23, %s42_s28  }
  0x15   : > { %s1793_s0 = sld [smem:[#allocation23_spill]]  ;;  %s321_s16 = scalar_lea.vmem [#allocation5], %s1030_s11 }
  0x16   : > { %1792 = sst [smem:[#allocation22_spill]] %s1626_s10  ;;  %s329_s17 = sshll.u32 %s321_s16, 4  ;;  %s330_s17 = int_to_ptr.vmem [resolvable:$true] %s329_s17 }
  0x17   : > { %p1200_p7 = pnand %p1215_p5, %p1615_p4  ;;  %p1639_p8 = pnand %p1215_p5, %p50_p2 }
  0x18   : > { %s1643_s19 = scalar_lea.sflag [#allocation6], %s317_s7  ;;  %s1647_s20 = sadd.s32 4294967295, %s1529_s26  }
  0x19   : > { %s1013_s28 = sadd.s32 4294967294, %s1529_s26   ;;  %p55_p9 = scmp.ne.s32.totalorder %s1513_s22, %s1509_s21 }
  0x1a   : > { %p56_p10 = scmp.eq.s32.totalorder %s1647_s20, 0  ;;  %p262_p11 = scmp.eq.s32.totalorder %s1647_s20, 1 }
  0x1b   : > { %s325_s14 = scalar_lea.hbm %s1793_s0, %s1031_s9  ;;  %p268_p12 = scmp.eq.s32.totalorder %s1013_s28, 1 }
  0x1c   : > { %s327_s15 = sshll.u32 %s325_s14, 4  ;;  %p1656_p13 = por %p56_p10, %p55_p9  ;;  %s328_s15 = int_to_ptr.hbm [resolvable:$true] %s327_s15 }
  0x1d   : > { %1202 = dma.hbm_to_vmem [thread:$0]  (!%p1200_p7), %s328_s15, 128, %s330_s17, %s1643_s19  }
  0x1e   : > { %p1026_p0 = scmp.ge.s32.totalorder %s1529_s26, 1  ;;  %p1664_p2 = por %p262_p11, %p49_p1 }
  0x1f   : > { %p1668_p4 = por %p268_p12, %p55_p9  ;;  %p275_p5 = scmp.lt.s32.totalorder %s1529_s26, 3 }
  0x20   : > { %s1798_s1 = sld [smem:[#allocation24_spill]]  ;;  %s1531_s13 = smov [#allocation8]  }
  0x21   : > { %p1676_p6 = pnand %p1026_p0, %p275_p5  ;;  %s289_s14 = sshll.u32 %s1531_s13, 4  ;;  %s290_s14 = int_to_ptr.vmem [resolvable:$true] %s289_s14 }
  0x22   : > { %s1800_s3 = sld [smem:[#allocation25_spill]]  ;;  %s301_s0 = sshll.u32 %s1780_s5, 4  ;;  %s302_s0 = int_to_ptr.hbm [resolvable:$true] %s301_s0 }
  0x23   : > { %p1192_p1 = pneg %p1676_p6  ;;  %s1532_s13 = smov [#allocation10]  }
  0x24   : > { %s1533_s15 = smov 64   ;;  %s1534_s16 = smov 4  }
  0x25   : > { %p1687_p7 = pnand %p1192_p1, %p56_p10  ;;  %s401_s25 = sshll.u32 %s1779_s4, 4  ;;  %s402_s25 = int_to_ptr.hbm [resolvable:$true] %s401_s25 }
  0x26   : > { %s287_s11 = sshll.u32 %s1798_s1, 4  ;;  %s364_s1 = sshll.u32 %s1532_s13, 4  ;;  %s288_s11 = int_to_ptr.hbm [resolvable:$true] %s287_s11  ;;  %s365_s1 = int_to_ptr.vmem [resolvable:$true] %s364_s1 }
  0x27   : > { %1195 = dma.hbm_to_vmem [thread:$0]  (!%p1687_p7), %s288_s11, 16, %s290_s14, [#allocation9]  }
  0x28   : > { %s362_s17 = sshll.u32 %s1800_s3, 4  ;;  %s1535_s10 = smov [#allocation12]   ;;  %s363_s17 = int_to_ptr.hbm [resolvable:$true] %s362_s17 }
  0x29   : > { %1205 = dma.hbm_to_vmem [thread:$0]  (!%p1639_p8), %s363_s17, 1024, %s365_s1, %s1643_s19, %s1533_s15, %s1533_s15, %s1534_s16  }
  0x2a   : > { %s303_s23 = sshll.u32 %s1535_s10, 4  ;;  %s1536_s8 = smov [#allocation11]   ;;  %s304_s23 = int_to_ptr.vmem [resolvable:$true] %s303_s23 }
  0x2b   : > { %1198 = dma.hbm_to_vmem [thread:$0]  (!%p1687_p7), %s302_s0, 1024, %s304_s23, [#allocation9], %s1533_s15, %s1533_s15, %s1534_s16  }
  0x2c   : > { %s403_s9 = sshll.u32 %s1536_s8, 4  ;;  %415 = sbr.rel (%p1676_p6) target bundleno = 609 (0x261), region = 44  ;;  %s404_s9 = int_to_ptr.vmem [resolvable:$true] %s403_s9 }
  0x2d   : > { %1208 = dma.hbm_to_vmem [thread:$0]  (!%p1639_p8), %s402_s25, 1024, %s404_s9, %s1643_s19, %s1533_s15, %s1533_s15, %s1534_s16  }
  0x2e   : > { %s417_s1 = sand.u32 (!%p1676_p6), 1, %s1647_s20   ;;  %s419_s3 = sand.u32 (!%p1676_p6), 1, %s1513_s22  }
  0x2f   : > { %s1713_s27 = sshll.u32 (!%p1676_p6), %s419_s3, 3  ;;  %s418_s10 = scalar_lea.sflag (!%p1676_p6), [#allocation6], %s417_s1 }
  0x30   : > { %s421_s0 = scalar_lea.vmem (!%p1676_p6), [#allocation5], %s1713_s27 }
  0x31   : > { %1488 = dma.done.wait (%p1656_p13), %s418_s10, 128  }
  0x32   : > { %1490 = vsyncadd (%p1656_p13), %s418_s10, 4294967168 }
  0x33   : > { %1492 = dma.done.wait (%p56_p10), [#allocation9], 16  }
  0x34   : > { %1494 = vsyncadd (%p56_p10), [#allocation9], 4294967280 }
  0x35   : > { %1496 = dma.done.wait (%p56_p10), %s418_s10, 2048  }
  0x36   : > { %1498 = vsyncadd (%p56_p10), %s418_s10, 4294965248 }
  0x37   : > { %1500 = dma.done.wait (%p56_p10), [#allocation9], 1024  }
  0x38   : > { %1502 = vsyncadd (%p56_p10), [#allocation9], 4294966272  ;;  %v530_v0 = vld [vmem:[%s421_s0] sm:$0xff]  ;;  %v535_v2 = vlaneseq  ;;  %v1152_v12 = vld [vmem:[#allocation12 + $0x20] sm:$0xff]  ;;  %s1145_s18 = sshll.u32 %s1521_s24, 3  ;;  %s490_s11 = scalar_lea.vmem [#allocation13], %s1713_s27 }
  0x39   : > { %531 = vadd.xlane.f32.xlu0 %v530_v0  ;;  %v1155_v1 = vld [vmem:[#allocation12 + $0x38] sm:$0xff]  ;;  %v1154_v9 = vld [vmem:[#allocation12 + $0x30] sm:$0xff]  ;;  %v1153_v10 = vld [vmem:[#allocation12 + $0x28] sm:$0xff]  ;;  %s868_s29 = scalar_lea.hbm %s1781_s6, %s1145_s18  ;;  %s870_s12 = sshll.u32 %s490_s11, 4  ;;  %s871_s12 = int_to_ptr.vmem [resolvable:$true] %s870_s12 }
  0x3a   : > { %632 = vmatpush.bf16.msra.mxu0 %v1155_v1  ;;  %v536_v3 = vand.u32 127, %v535_v2  ;;  %v1163_v11 = vld [vmem:[#allocation10 + $0x38] sm:$0xff]  ;;  %v1162_v13 = vld [vmem:[#allocation10 + $0x30] sm:$0xff]  ;;  %v1161_v15 = vld [vmem:[#allocation10 + $0x28] sm:$0xff]  ;;  %v668_v35 = vshrl.u32 %v535_v2, 7  ;;  %s872_s14 = sshll.u32 %s868_s29, 4  ;;  %s873_s14 = int_to_ptr.hbm [resolvable:$true] %s872_s14 }
  0x3b   : > { %753 = vmatpush.bf16.msra.mxu1 %v1163_v11  ;;  %v1151_v14 = vld [vmem:[#allocation12 + $0x18] sm:$0xff]  ;;  %v1150_v16 = vld [vmem:[#allocation12 + $0x10] sm:$0xff]  ;;  %v1160_v17 = vld [vmem:[#allocation10 + $0x20] sm:$0xff]  ;;  %s858_s17 = scalar_lea.sflag [#allocation7], %s419_s3  ;;  %s1449_s28 = sshra.s32 %s873_s14, 4  ;;  %s1450_s28 = int_to_ptr.hbm [resolvable:$true] %s1449_s28 }
  0x3c   : > { %vm537_vm0 = vcmp.lt.s32.totalorder %v536_v3, 32  ;;  %v1149_v18 = vld [vmem:[#allocation12 + $0x8] sm:$0xff]  ;;  %v1159_v19 = vld [vmem:[#allocation10 + $0x18] sm:$0xff]  ;;  %v1148_v20 = vld [vmem:[#allocation12] sm:$0xff]  ;;  %v673_v42 = vand.u32 7, %v668_v35  ;;  %s1451_s24 = scalar_lea.hbm %s1450_s28, 8  ;;  %p1456_p11 = scmp.lt.s32.totalorder %s1450_s28, %s1781_s6 }
  0x3d   : > { %v1158_v21 = vld [vmem:[#allocation10 + $0x10] sm:$0xff]  ;;  %v1157_v24 = vld [vmem:[#allocation10 + $0x8] sm:$0xff]  ;;  %v1156_v26 = vld [vmem:[#allocation10] sm:$0xff]  ;;  %p1452_p8 = scmp.ne.s32.totalorder %s1450_s28, %s1451_s24  ;;  %s1455_s16 = scalar_lea.hbm %s1781_s6, 16 }
  0x3e   : > { %633 = vmatpush.bf16.msra.mxu0 %v1154_v9  ;;  %v1171_v27 = vld [vmem:[#allocation11 + $0x38] sm:$0xff]  ;;  %v1170_v30 = vld [vmem:[#allocation11 + $0x30] sm:$0xff]  ;;  %v1169_v33 = vld [vmem:[#allocation11 + $0x28] sm:$0xff]  ;;  %vm681_vm4 = vcmp.eq.s32.totalorder %v673_v42, 0  ;;  %p1457_p12 = scmp.lt.s32.totalorder %s1455_s16, %s1451_s24 }
  0x3f   : > { %754 = vmatpush.bf16.msra.mxu1 %v1162_v13  ;;  %834 = vmatpush.bf16.msra.mxu2 %v1171_v27  ;;  %v1168_v37 = vld [vmem:[#allocation11 + $0x20] sm:$0xff]  ;;  %v1277_v38 = vld [vmem:[#allocation8] ss:$0 sm:$0xff]  ;;  %v1166_v51 = vld [vmem:[#allocation11 + $0x10] sm:$0xff]  ;;  %p1453_p9 = pnand %p1452_p8, %p1664_p2 }
  0x40   : > { %v1278_v41 = vld [vmem:[%s1777_s2] ss:$0 sm:$0xff]  ;;  %v1167_v50 = vld [vmem:[#allocation11 + $0x18] sm:$0xff]  ;;  %v1165_v52 = vld [vmem:[#allocation11 + $0x8] sm:$0xff]  ;;  %p1458_p13 = por %p1457_p12, %p1456_p11 }
  0x41   : > { %v1164_v53 = vld [vmem:[#allocation11] sm:$0xff]  ;;  %p1454_p10 = pneg %p1453_p9 }
  0x42   : > { %634 = vmatpush.bf16.msra.mxu0 %v1153_v10 }
  0x43   : > { %755 = vmatpush.bf16.msra.mxu1 %v1161_v15  ;;  %835 = vmatpush.bf16.msra.mxu2 %v1170_v30  ;;  %p1459_p0 = pnand %p1458_p13, %p1454_p10 }
  0x46   : > { %635 = vmatpush.bf16.msra.mxu0 %v1152_v12 }
  0x47   : > { %756 = vmatpush.bf16.msra.mxu1 %v1160_v17  ;;  %836 = vmatpush.bf16.msra.mxu2 %v1169_v33 }
  0x4a   : > { %636 = vmatpush.bf16.msra.mxu0 %v1151_v14 }
  0x4b   : > { %757 = vmatpush.bf16.msra.mxu1 %v1159_v19  ;;  %837 = vmatpush.bf16.msra.mxu2 %v1168_v37 }
  0x4e   : > { %637 = vmatpush.bf16.msra.mxu0 %v1150_v16 }
  0x4f   : > { %758 = vmatpush.bf16.msra.mxu1 %v1158_v21  ;;  %838 = vmatpush.bf16.msra.mxu2 %v1167_v50 }
  0x52   : > { %638 = vmatpush.bf16.msra.mxu0 %v1149_v18 }
  0x53   : > { %759 = vmatpush.bf16.msra.mxu1 %v1157_v24  ;;  %839 = vmatpush.bf16.msra.mxu2 %v1166_v51 }
  0x56   : > { %639 = vmatpush.bf16.msra.mxu0 %v1148_v20 }
  0x57   : > { %760 = vmatpush.bf16.msra.mxu1 %v1156_v26  ;;  %840 = vmatpush.bf16.msra.mxu2 %v1165_v52 }
  0x5b   : > { %841 = vmatpush.bf16.msra.mxu2 %v1164_v53 }
  0xac   : > { %v532_v4 = vpop.xlane.xlu0 %531 }
  0xad   : > { %v533_v5 = vmul.f32 0.03125, %v532_v4 }
  0xaf   : > { %v534_v6 = vsub.f32 %v530_v0, %v533_v5 }
  0xb1   : > { %v540_v7 = vsel %vm537_vm0, %v534_v6, 0.0 }
  0xb2   : > { %v541_v8 = vmul.f32 %v540_v7, %v540_v7 }
  0xb4   : > { %542 = vadd.xlane.f32.xlu0 %v541_v8 }
 0x127   : > { %v543_v22 = vpop.xlane.xlu0 %542 }
 0x128   : > { %v544_v23 = vmul.f32 0.03125, %v543_v22 }
 0x12a   : > { %v545_v25 = vadd.f32 1e-12, %v544_v23 }
 0x12c   : > { %1279 = vrsqrt.f32 %v545_v25  ;;  %vm552_vm2 = vweird.f32 %v545_v25 }
 0x132   : > { %v1280_v28 = vpop.eup %1279 }
 0x133   : > { %v547_v29 = vmul.f32 %v1280_v28, %v545_v25  ;;  %vm553_vm1 = vweird.f32 %v1280_v28 }
 0x134   : > { %vm554_vm3 = vmor %vm552_vm2, %vm553_vm1 }
 0x135   : > { %v548_v31 = vmul.f32 %v1280_v28, %v547_v29 }
 0x137   : > { %v549_v32 = vmul.f32 0.5, %v548_v31 }
 0x139   : > { %v550_v34 = vsub.f32 1.5, %v549_v32 }
 0x13b   : > { %v551_v36 = vmul.f32 %v1280_v28, %v550_v34 }
 0x13d   : > { %v555_v39 = vsel %vm554_vm3, %v1280_v28, %v551_v36 }
 0x13e   : > { %v556_v40 = vmul.f32 %v555_v39, %v540_v7 }
 0x140   : > { %v561_v43 = vmul.f32 %v1277_v38, %v556_v40 }
 0x142   : > { %v566_v44 = vadd.f32 %v1278_v41, %v561_v43 }
 0x144   : > { %v567_v45 = vpack.c.bf16 %v566_v44, %v566_v44  ;;  %v666_v46 = vrot.slane %v566_v44, 7 }
 0x146   : > { %640 = vmatmul.bf16.vlgmr.msra.gmra.mxu0 %v567_v45  ;;  %v684_v47 = vsel %vm681_vm4, 0.0, %v666_v46 }
 0x147   : > { %v685_v48 = vpack.c.bf16 %v684_v47, %v684_v47 }
 0x149   : > { %686 = vst [vmem:[#allocation2] sm:$0xf] %v685_v48 }
 0x150   : > { %v688_v49 = vld [vmem:[#allocation2] sm:$0xf] }
 0x151   : > { %761 = vmatmul.bf16.vlgmr.msra.gmra.mxu1 %v688_v49 }
 0x1c3   : > { %v641_v54 = vpop.f32.mrf.mxu0 }
 0x1c4   : > { %v1079_v55 = vmul.f32 -1.442695, %v641_v54 }
 0x1c6   : > { %1281 = vpow2.f32 %v1079_v55 }
 0x1cb   : > { %v643_v56 = vpop.f32.mrf.mxu0 }
 0x1cc   : > { %v1282_v57 = vpop.eup %1281 }
 0x1cd   : > { %v648_v58 = vadd.f32 1.0, %v1282_v57 }
 0x1ce   : > { %v762_v59 = vpop.f32.mrf.mxu1 }
 0x1cf   : > { %1283 = vrcp.f32 %v648_v58  ;;  %v766_v60 = vmax.f32 %v762_v59, 0.0  ;;  %v660_v3 = vand.u32 2147483648, %v648_v58  ;;  %v658_v5 = vand.u32 2147483647, %v648_v58 }
 0x1d0   : > { %vm654_vm6 = vweird.f32 %v648_v58 }
 0x1d1   : > { %v767_v61 = vmul.f32 %v766_v60, %v766_v60  ;;  %v661_v7 = vor.u32 1.1754944e-38, %v660_v3  ;;  %vm659_vm8 = vcmp.eq.f32.partialorder %v658_v5, 8.507059e+37 }
 0x1d3   : > { %v769_v62 = vpack.c.bf16 %v767_v61, %v767_v61 }
 0x1d5   : > { %v1284_v63 = vpop.eup %1283  ;;  %842 = vmatmul.bf16.vlgmr.msra.gmra.mxu2 %v769_v62 }
 0x1d6   : > { %v650_v0 = vmul.f32 %v1284_v63, %v648_v58  ;;  %v764_v1 = vpop.f32.mrf.mxu1  ;;  %vm655_vm5 = vweird.f32 %v1284_v63 }
 0x1d7   : > { %vm656_vm7 = vmor %vm654_vm6, %vm655_vm5 }
 0x1d8   : > { %v651_v2 = vsub.f32 1.0, %v650_v0 }
 0x1da   : > { %v652_v4 = vmul.f32 %v1284_v63, %v651_v2 }
 0x1dc   : > { %v653_v6 = vadd.f32 %v1284_v63, %v652_v4 }
 0x1de   : > { %v657_v8 = vsel %vm656_vm7, %v1284_v63, %v653_v6 }
 0x1df   : > { %v662_v9 = vsel %vm659_vm8, %v661_v7, %v657_v8 }
 0x1e0   : > { %v664_v10 = vpack.c.bf16 %v662_v9, %v662_v9 }
 0x1e2   : > { %665 = vst [vmem:[#allocation3] sm:$0xf] %v664_v10 }
 0x1e9   : > { %v852_v11 = vld [vmem:[#allocation3] sm:$0xf] }
 0x1ea   : > { %v853_v12 = vunpack.c.l.bf16 %v852_v11 }
 0x258   : > { %v843_v13 = vpop.f32.mrf.mxu2 }
 0x259   : > { %v855_v14 = vmul.f32 %v853_v12, %v843_v13 }
 0x25b   : > { %856 = vst [vmem:[%s490_s11] sm:$0xff] %v855_v14 }
 0x25c   : > { %1462 = shalt.err (!%p1459_p0)
}
 0x25d   : > { %1190 = dma.vmem_to_hbm [thread:$0]  (%p1664_p2), %s871_s12, 128, %s873_s14, %s858_s17  }
 0x260   : > { %v845_v15 = vpop.f32.mrf.mxu2 }
 0x261 PF: > { %s884_s1 = sand.u32 1, %s1509_s21   ;;  %p1210_p5 = pnand %p1029_p3, %p1668_p4 }
 0x262   : > { %s885_s3 = scalar_lea.sflag [#allocation7], %s884_s1 }
 0x263   : > { %p1211_p6 = pneg %p1210_p5 }
 0x265   : > { %1504 = dma.done.wait (%p1211_p6), %s885_s3, 128  }
 0x266   : > { %1506 = vsyncadd (%p1211_p6), %s885_s3, 4294967168  ;;  %s23_s26 = sadd.s32 1, %s1529_s26   ;;  %s1802_s27 = sld [smem:[#allocation19_spill]] }
 0x267   : > { %p20_p1 = scmp.ge.s32.totalorder %s23_s26, 4   ;;  %s1803_s23 = sld [smem:[#allocation22_spill]] }
 0x268   : > { %s1804_s24 = sld [smem:[#allocation20_spill]]  ;;  %s1806_s21 = smov %s1513_s22 }
 0x269   : > { %s1805_s25 = sld [smem:[#allocation21_spill]]  ;;  %22 = sbr.rel (!%p20_p1) target bundleno = 11 (0xb), region = 127 }
 0x26c   : > { %s1807_s22 = smov %s1802_s27 }
 0x26e   :  { %891 = vsyncpa [#allocation6], 1 }
 0x26f   :  { %893 = vsyncpa [#allocation6 + $0x1], 1 }
 0x270   :  { %894 = vsyncpa [#allocation9], 1 }
 0x271   :  { %895 = vsyncpa [#allocation7], 1 }
 0x272   :  { %897 = vsyncpa [#allocation7 + $0x1], 1 }

// kernel: tpu_custom_call.1
= control target key start
LH: loop header
LB: loop body
LE: loop exit
PB: predicated region body
PF: predicated region fallthrough
CT: control target
= control target key end

     0   :  { %s1775_s0 = inlined_call_operand.hbm [shape: f32[16,128], index: 0, kind: input, shape index: {}]   ;;  %s1776_s1 = inlined_call_operand.hbm [shape: f32[1,128], index: 1, kind: input, shape index: {}]   ;;  %s1777_s2 = inlined_call_operand.vmem [shape: f32[1,128], index: 2, kind: input, shape index: {}]   ;;  %s1778_s3 = inlined_call_operand.hbm [shape: bf16[128,128], index: 3, kind: input, shape index: {}]   ;;  %s1779_s4 = inlined_call_operand.hbm [shape: bf16[128,128], index: 4, kind: input, shape index: {}]   ;;  %s1780_s5 = inlined_call_operand.hbm [shape: bf16[128,128], index: 5, kind: input, shape index: {}]   ;;  %s1781_s6 = inlined_call_operand.hbm [shape: f32[16,128], index: 6, kind: output, shape index: {}]  }
   0x1   :  { %1785 = sst [smem:[#allocation23_spill]] %s1775_s0 }
   0x2   :  { %1786 = sst [smem:[#allocation24_spill]] %s1776_s1 }
   0x3   :  { %1787 = sst [smem:[#allocation25_spill]] %s1778_s3 }
   0x4   :  { %11 = vsyncpa [#allocation6], 0 }
   0x5   :  { %13 = vsyncpa [#allocation6 + $0x1], 0 }
   0x6   :  { %14 = vsyncpa [#allocation9], 0 }
   0x7   :  { %15 = vsyncpa [#allocation7], 0 }
   0x8   :  { %17 = vsyncpa [#allocation7 + $0x1], 0  ;;  %s1572_s21 = smov 0   ;;  %s1574_s22 = smov 0  }
   0x9   :  { %s1576_s23 = smov 0   ;;  %s1578_s24 = smov 0  }
   0xa   :  { %s1580_s25 = smov 0   ;;  %s1582_s26 = smov 0  }
   0xb LB: > { %1788 = sst [smem:[#allocation19_spill]] %s1517_s23  ;;  %s35_s27 = sadd.s32 1, %s1525_s25  ;;  %s1529_s26 = sphi %s1582_s26, %s23_s26   ;;  %s1525_s25 = sphi %s1580_s25, %s1805_s25   ;;  %s1521_s24 = sphi %s1578_s24, %s1804_s24   ;;  %s1517_s23 = sphi %s1576_s23, %s1803_s23   ;;  %s1513_s22 = sphi %s1574_s22, %s1807_s22   ;;  %s1509_s21 = sphi %s1572_s21, %s1806_s21  }
   0xc   : > { %1789 = sst [smem:[#allocation20_spill]] %s1525_s25  ;;  %s42_s28 = sadd.s32 1, %s1517_s23 }
   0xd   : > { %p37_p0 = scmp.ge.s32.totalorder %s35_s27, 2  ;;  %p49_p1 = scmp.ne.s32.totalorder %s1517_s23, %s1513_s22 }
   0xe   : > { %p50_p2 = scmp.eq.s32.totalorder %s1529_s26, 0  ;;  %p1029_p3 = scmp.ge.s32.totalorder %s1529_s26, 2 }
   0xf   : > { %s1809_s27 = smov (%p37_p0, %s35_s27), 0  ;;  %p1215_p5 = scmp.lt.s32.totalorder %s1529_s26, 2 }
  0x10   : > { %1790 = sst [smem:[#allocation21_spill]] %s1809_s27  ;;  %p1615_p4 = por %p50_p2, %p49_p1 }
  0x11   : > { %s39_s30 = ssub.s32 %s1525_s25, %s1809_s27  ;;  %s317_s7 = sand.u32 1, %s1529_s26  }
  0x12   : > { %p40_p6 = scmp.eq.s32.totalorder %s39_s30, 0  ;;  %s319_s8 = sand.u32 1, %s1517_s23  }
  0x13   : > { %s1031_s9 = sshll.u32 %s1525_s25, 3  ;;  %s1030_s11 = sshll.u32 %s319_s8, 3 }
  0x14   : > { %s1626_s10 = scalar_select %p40_p6, %s1517_s23, %s42_s28  }
  0x15   : > { %s1793_s0 = sld [smem:[#allocation23_spill]]  ;;  %s321_s16 = scalar_lea.vmem [#allocation5], %s1030_s11 }
  0x16   : > { %1792 = sst [smem:[#allocation22_spill]] %s1626_s10  ;;  %s329_s17 = sshll.u32 %s321_s16, 4  ;;  %s330_s17 = int_to_ptr.vmem [resolvable:$true] %s329_s17 }
  0x17   : > { %p1200_p7 = pnand %p1215_p5, %p1615_p4  ;;  %p1639_p8 = pnand %p1215_p5, %p50_p2 }
  0x18   : > { %s1643_s19 = scalar_lea.sflag [#allocation6], %s317_s7  ;;  %s1647_s20 = sadd.s32 4294967295, %s1529_s26  }
  0x19   : > { %s1013_s28 = sadd.s32 4294967294, %s1529_s26   ;;  %p55_p9 = scmp.ne.s32.totalorder %s1513_s22, %s1509_s21 }
  0x1a   : > { %p56_p10 = scmp.eq.s32.totalorder %s1647_s20, 0  ;;  %p262_p11 = scmp.eq.s32.totalorder %s1647_s20, 1 }
  0x1b   : > { %s325_s14 = scalar_lea.hbm %s1793_s0, %s1031_s9  ;;  %p268_p12 = scmp.eq.s32.totalorder %s1013_s28, 1 }
  0x1c   : > { %s327_s15 = sshll.u32 %s325_s14, 4  ;;  %p1656_p13 = por %p56_p10, %p55_p9  ;;  %s328_s15 = int_to_ptr.hbm [resolvable:$true] %s327_s15 }
  0x1d   : > { %1202 = dma.hbm_to_vmem [thread:$0]  (!%p1200_p7), %s328_s15, 128, %s330_s17, %s1643_s19  }
  0x1e   : > { %p1026_p0 = scmp.ge.s32.totalorder %s1529_s26, 1  ;;  %p1664_p2 = por %p262_p11, %p49_p1 }
  0x1f   : > { %p1668_p4 = por %p268_p12, %p55_p9  ;;  %p275_p5 = scmp.lt.s32.totalorder %s1529_s26, 3 }
  0x20   : > { %s1798_s1 = sld [smem:[#allocation24_spill]]  ;;  %s1531_s13 = smov [#allocation8]  }
  0x21   : > { %p1676_p6 = pnand %p1026_p0, %p275_p5  ;;  %s289_s14 = sshll.u32 %s1531_s13, 4  ;;  %s290_s14 = int_to_ptr.vmem [resolvable:$true] %s289_s14 }
  0x22   : > { %s1800_s3 = sld [smem:[#allocation25_spill]]  ;;  %s301_s0 = sshll.u32 %s1780_s5, 4  ;;  %s302_s0 = int_to_ptr.hbm [resolvable:$true] %s301_s0 }
  0x23   : > { %p1192_p1 = pneg %p1676_p6  ;;  %s1532_s13 = smov [#allocation10]  }
  0x24   : > { %s1533_s15 = smov 64   ;;  %s1534_s16 = smov 4  }
  0x25   : > { %p1687_p7 = pnand %p1192_p1, %p56_p10  ;;  %s401_s25 = sshll.u32 %s1779_s4, 4  ;;  %s402_s25 = int_to_ptr.hbm [resolvable:$true] %s401_s25 }
  0x26   : > { %s287_s11 = sshll.u32 %s1798_s1, 4  ;;  %s364_s1 = sshll.u32 %s1532_s13, 4  ;;  %s288_s11 = int_to_ptr.hbm [resolvable:$true] %s287_s11  ;;  %s365_s1 = int_to_ptr.vmem [resolvable:$true] %s364_s1 }
  0x27   : > { %1195 = dma.hbm_to_vmem [thread:$0]  (!%p1687_p7), %s288_s11, 16, %s290_s14, [#allocation9]  }
  0x28   : > { %s362_s17 = sshll.u32 %s1800_s3, 4  ;;  %s1535_s10 = smov [#allocation12]   ;;  %s363_s17 = int_to_ptr.hbm [resolvable:$true] %s362_s17 }
  0x29   : > { %1205 = dma.hbm_to_vmem [thread:$0]  (!%p1639_p8), %s363_s17, 1024, %s365_s1, %s1643_s19, %s1533_s15, %s1533_s15, %s1534_s16  }
  0x2a   : > { %s303_s23 = sshll.u32 %s1535_s10, 4  ;;  %s1536_s8 = smov [#allocation11]   ;;  %s304_s23 = int_to_ptr.vmem [resolvable:$true] %s303_s23 }
  0x2b   : > { %1198 = dma.hbm_to_vmem [thread:$0]  (!%p1687_p7), %s302_s0, 1024, %s304_s23, [#allocation9], %s1533_s15, %s1533_s15, %s1534_s16  }
  0x2c   : > { %s403_s9 = sshll.u32 %s1536_s8, 4  ;;  %415 = sbr.rel (%p1676_p6) target bundleno = 609 (0x261), region = 44  ;;  %s404_s9 = int_to_ptr.vmem [resolvable:$true] %s403_s9 }
  0x2d   : > { %1208 = dma.hbm_to_vmem [thread:$0]  (!%p1639_p8), %s402_s25, 1024, %s404_s9, %s1643_s19, %s1533_s15, %s1533_s15, %s1534_s16  }
  0x2e   : > { %s417_s1 = sand.u32 (!%p1676_p6), 1, %s1647_s20   ;;  %s419_s3 = sand.u32 (!%p1676_p6), 1, %s1513_s22  }
  0x2f   : > { %s1713_s27 = sshll.u32 (!%p1676_p6), %s419_s3, 3  ;;  %s418_s10 = scalar_lea.sflag (!%p1676_p6), [#allocation6], %s417_s1 }
  0x30   : > { %s421_s0 = scalar_lea.vmem (!%p1676_p6), [#allocation5], %s1713_s27 }
  0x31   : > { %1488 = dma.done.wait (%p1656_p13), %s418_s10, 128  }
  0x32   : > { %1490 = vsyncadd (%p1656_p13), %s418_s10, 4294967168 }
  0x33   : > { %1492 = dma.done.wait (%p56_p10), [#allocation9], 16  }
  0x34   : > { %1494 = vsyncadd (%p56_p10), [#allocation9], 4294967280 }
  0x35   : > { %1496 = dma.done.wait (%p56_p10), %s418_s10, 2048  }
  0x36   : > { %1498 = vsyncadd (%p56_p10), %s418_s10, 4294965248 }
  0x37   : > { %1500 = dma.done.wait (%p56_p10), [#allocation9], 1024  }
  0x38   : > { %1502 = vsyncadd (%p56_p10), [#allocation9], 4294966272  ;;  %v530_v0 = vld [vmem:[%s421_s0] sm:$0xff]  ;;  %v535_v2 = vlaneseq  ;;  %v1152_v12 = vld [vmem:[#allocation12 + $0x20] sm:$0xff]  ;;  %s1145_s18 = sshll.u32 %s1521_s24, 3  ;;  %s490_s11 = scalar_lea.vmem [#allocation13], %s1713_s27 }
  0x39   : > { %531 = vadd.xlane.f32.xlu0 %v530_v0  ;;  %v1155_v1 = vld [vmem:[#allocation12 + $0x38] sm:$0xff]  ;;  %v1154_v9 = vld [vmem:[#allocation12 + $0x30] sm:$0xff]  ;;  %v1153_v10 = vld [vmem:[#allocation12 + $0x28] sm:$0xff]  ;;  %s868_s29 = scalar_lea.hbm %s1781_s6, %s1145_s18  ;;  %s870_s12 = sshll.u32 %s490_s11, 4  ;;  %s871_s12 = int_to_ptr.vmem [resolvable:$true] %s870_s12 }
  0x3a   : > { %632 = vmatpush.bf16.msra.mxu0 %v1155_v1  ;;  %v536_v3 = vand.u32 127, %v535_v2  ;;  %v1163_v11 = vld [vmem:[#allocation10 + $0x38] sm:$0xff]  ;;  %v1162_v13 = vld [vmem:[#allocation10 + $0x30] sm:$0xff]  ;;  %v1161_v15 = vld [vmem:[#allocation10 + $0x28] sm:$0xff]  ;;  %v668_v35 = vshrl.u32 %v535_v2, 7  ;;  %s872_s14 = sshll.u32 %s868_s29, 4  ;;  %s873_s14 = int_to_ptr.hbm [resolvable:$true] %s872_s14 }
  0x3b   : > { %753 = vmatpush.bf16.msra.mxu1 %v1163_v11  ;;  %v1151_v14 = vld [vmem:[#allocation12 + $0x18] sm:$0xff]  ;;  %v1150_v16 = vld [vmem:[#allocation12 + $0x10] sm:$0xff]  ;;  %v1160_v17 = vld [vmem:[#allocation10 + $0x20] sm:$0xff]  ;;  %s858_s17 = scalar_lea.sflag [#allocation7], %s419_s3  ;;  %s1449_s28 = sshra.s32 %s873_s14, 4  ;;  %s1450_s28 = int_to_ptr.hbm [resolvable:$true] %s1449_s28 }
  0x3c   : > { %vm537_vm0 = vcmp.lt.s32.totalorder %v536_v3, 32  ;;  %v1149_v18 = vld [vmem:[#allocation12 + $0x8] sm:$0xff]  ;;  %v1159_v19 = vld [vmem:[#allocation10 + $0x18] sm:$0xff]  ;;  %v1148_v20 = vld [vmem:[#allocation12] sm:$0xff]  ;;  %v673_v42 = vand.u32 7, %v668_v35  ;;  %s1451_s24 = scalar_lea.hbm %s1450_s28, 8  ;;  %p1456_p11 = scmp.lt.s32.totalorder %s1450_s28, %s1781_s6 }
  0x3d   : > { %v1158_v21 = vld [vmem:[#allocation10 + $0x10] sm:$0xff]  ;;  %v1157_v24 = vld [vmem:[#allocation10 + $0x8] sm:$0xff]  ;;  %v1156_v26 = vld [vmem:[#allocation10] sm:$0xff]  ;;  %p1452_p8 = scmp.ne.s32.totalorder %s1450_s28, %s1451_s24  ;;  %s1455_s16 = scalar_lea.hbm %s1781_s6, 16 }
  0x3e   : > { %633 = vmatpush.bf16.msra.mxu0 %v1154_v9  ;;  %v1171_v27 = vld [vmem:[#allocation11 + $0x38] sm:$0xff]  ;;  %v1170_v30 = vld [vmem:[#allocation11 + $0x30] sm:$0xff]  ;;  %v1169_v33 = vld [vmem:[#allocation11 + $0x28] sm:$0xff]  ;;  %vm681_vm4 = vcmp.eq.s32.totalorder %v673_v42, 0  ;;  %p1457_p12 = scmp.lt.s32.totalorder %s1455_s16, %s1451_s24 }
  0x3f   : > { %754 = vmatpush.bf16.msra.mxu1 %v1162_v13  ;;  %834 = vmatpush.bf16.msra.mxu2 %v1171_v27  ;;  %v1168_v37 = vld [vmem:[#allocation11 + $0x20] sm:$0xff]  ;;  %v1277_v38 = vld [vmem:[#allocation8] ss:$0 sm:$0xff]  ;;  %v1166_v51 = vld [vmem:[#allocation11 + $0x10] sm:$0xff]  ;;  %p1453_p9 = pnand %p1452_p8, %p1664_p2 }
  0x40   : > { %v1278_v41 = vld [vmem:[%s1777_s2] ss:$0 sm:$0xff]  ;;  %v1167_v50 = vld [vmem:[#allocation11 + $0x18] sm:$0xff]  ;;  %v1165_v52 = vld [vmem:[#allocation11 + $0x8] sm:$0xff]  ;;  %p1458_p13 = por %p1457_p12, %p1456_p11 }
  0x41   : > { %v1164_v53 = vld [vmem:[#allocation11] sm:$0xff]  ;;  %p1454_p10 = pneg %p1453_p9 }
  0x42   : > { %634 = vmatpush.bf16.msra.mxu0 %v1153_v10 }
  0x43   : > { %755 = vmatpush.bf16.msra.mxu1 %v1161_v15  ;;  %835 = vmatpush.bf16.msra.mxu2 %v1170_v30  ;;  %p1459_p0 = pnand %p1458_p13, %p1454_p10 }
  0x46   : > { %635 = vmatpush.bf16.msra.mxu0 %v1152_v12 }
  0x47   : > { %756 = vmatpush.bf16.msra.mxu1 %v1160_v17  ;;  %836 = vmatpush.bf16.msra.mxu2 %v1169_v33 }
  0x4a   : > { %636 = vmatpush.bf16.msra.mxu0 %v1151_v14 }
  0x4b   : > { %757 = vmatpush.bf16.msra.mxu1 %v1159_v19  ;;  %837 = vmatpush.bf16.msra.mxu2 %v1168_v37 }
  0x4e   : > { %637 = vmatpush.bf16.msra.mxu0 %v1150_v16 }
  0x4f   : > { %758 = vmatpush.bf16.msra.mxu1 %v1158_v21  ;;  %838 = vmatpush.bf16.msra.mxu2 %v1167_v50 }
  0x52   : > { %638 = vmatpush.bf16.msra.mxu0 %v1149_v18 }
  0x53   : > { %759 = vmatpush.bf16.msra.mxu1 %v1157_v24  ;;  %839 = vmatpush.bf16.msra.mxu2 %v1166_v51 }
  0x56   : > { %639 = vmatpush.bf16.msra.mxu0 %v1148_v20 }
  0x57   : > { %760 = vmatpush.bf16.msra.mxu1 %v1156_v26  ;;  %840 = vmatpush.bf16.msra.mxu2 %v1165_v52 }
  0x5b   : > { %841 = vmatpush.bf16.msra.mxu2 %v1164_v53 }
  0xac   : > { %v532_v4 = vpop.xlane.xlu0 %531 }
  0xad   : > { %v533_v5 = vmul.f32 0.03125, %v532_v4 }
  0xaf   : > { %v534_v6 = vsub.f32 %v530_v0, %v533_v5 }
  0xb1   : > { %v540_v7 = vsel %vm537_vm0, %v534_v6, 0.0 }
  0xb2   : > { %v541_v8 = vmul.f32 %v540_v7, %v540_v7 }
  0xb4   : > { %542 = vadd.xlane.f32.xlu0 %v541_v8 }
 0x127   : > { %v543_v22 = vpop.xlane.xlu0 %542 }
 0x128   : > { %v544_v23 = vmul.f32 0.03125, %v543_v22 }
 0x12a   : > { %v545_v25 = vadd.f32 1e-12, %v544_v23 }
 0x12c   : > { %1279 = vrsqrt.f32 %v545_v25  ;;  %vm552_vm2 = vweird.f32 %v545_v25 }
 0x132   : > { %v1280_v28 = vpop.eup %1279 }
 0x133   : > { %v547_v29 = vmul.f32 %v1280_v28, %v545_v25  ;;  %vm553_vm1 = vweird.f32 %v1280_v28 }
 0x134   : > { %vm554_vm3 = vmor %vm552_vm2, %vm553_vm1 }
 0x135   : > { %v548_v31 = vmul.f32 %v1280_v28, %v547_v29 }
 0x137   : > { %v549_v32 = vmul.f32 0.5, %v548_v31 }
 0x139   : > { %v550_v34 = vsub.f32 1.5, %v549_v32 }
 0x13b   : > { %v551_v36 = vmul.f32 %v1280_v28, %v550_v34 }
 0x13d   : > { %v555_v39 = vsel %vm554_vm3, %v1280_v28, %v551_v36 }
 0x13e   : > { %v556_v40 = vmul.f32 %v555_v39, %v540_v7 }
 0x140   : > { %v561_v43 = vmul.f32 %v1277_v38, %v556_v40 }
 0x142   : > { %v566_v44 = vadd.f32 %v1278_v41, %v561_v43 }
 0x144   : > { %v567_v45 = vpack.c.bf16 %v566_v44, %v566_v44  ;;  %v666_v46 = vrot.slane %v566_v44, 7 }
 0x146   : > { %640 = vmatmul.bf16.vlgmr.msra.gmra.mxu0 %v567_v45  ;;  %v684_v47 = vsel %vm681_vm4, 0.0, %v666_v46 }
 0x147   : > { %v685_v48 = vpack.c.bf16 %v684_v47, %v684_v47 }
 0x149   : > { %686 = vst [vmem:[#allocation2] sm:$0xf] %v685_v48 }
 0x150   : > { %v688_v49 = vld [vmem:[#allocation2] sm:$0xf] }
 0x151   : > { %761 = vmatmul.bf16.vlgmr.msra.gmra.mxu1 %v688_v49 }
 0x1c3   : > { %v641_v54 = vpop.f32.mrf.mxu0 }
 0x1c4   : > { %v1079_v55 = vmul.f32 -1.442695, %v641_v54 }
 0x1c6   : > { %1281 = vpow2.f32 %v1079_v55 }
 0x1cb   : > { %v643_v56 = vpop.f32.mrf.mxu0 }
 0x1cc   : > { %v1282_v57 = vpop.eup %1281 }
 0x1cd   : > { %v648_v58 = vadd.f32 1.0, %v1282_v57 }
 0x1ce   : > { %v762_v59 = vpop.f32.mrf.mxu1 }
 0x1cf   : > { %1283 = vrcp.f32 %v648_v58  ;;  %v766_v60 = vmax.f32 %v762_v59, 0.0  ;;  %v660_v3 = vand.u32 2147483648, %v648_v58  ;;  %v658_v5 = vand.u32 2147483647, %v648_v58 }
 0x1d0   : > { %vm654_vm6 = vweird.f32 %v648_v58 }
 0x1d1   : > { %v767_v61 = vmul.f32 %v766_v60, %v766_v60  ;;  %v661_v7 = vor.u32 1.1754944e-38, %v660_v3  ;;  %vm659_vm8 = vcmp.eq.f32.partialorder %v658_v5, 8.507059e+37 }
 0x1d3   : > { %v769_v62 = vpack.c.bf16 %v767_v61, %v767_v61 }
 0x1d5   : > { %v1284_v63 = vpop.eup %1283  ;;  %842 = vmatmul.bf16.vlgmr.msra.gmra.mxu2 %v769_v62 }
 0x1d6   : > { %v650_v0 = vmul.f32 %v1284_v63, %v648_v58  ;;  %v764_v1 = vpop.f32.mrf.mxu1  ;;  %vm655_vm5 = vweird.f32 %v1284_v63 }
 0x1d7   : > { %vm656_vm7 = vmor %vm654_vm6, %vm655_vm5 }
 0x1d8   : > { %v651_v2 = vsub.f32 1.0, %v650_v0 }
 0x1da   : > { %v652_v4 = vmul.f32 %v1284_v63, %v651_v2 }
 0x1dc   : > { %v653_v6 = vadd.f32 %v1284_v63, %v652_v4 }
 0x1de   : > { %v657_v8 = vsel %vm656_vm7, %v1284_v63, %v653_v6 }
 0x1df   : > { %v662_v9 = vsel %vm659_vm8, %v661_v7, %v657_v8 }
 0x1e0   : > { %v664_v10 = vpack.c.bf16 %v662_v9, %v662_v9 }
 0x1e2   : > { %665 = vst [vmem:[#allocation3] sm:$0xf] %v664_v10 }
 0x1e9   : > { %v852_v11 = vld [vmem:[#allocation3] sm:$0xf] }
 0x1ea   : > { %v853_v12 = vunpack.c.l.bf16 %v852_v11 }
 0x258   : > { %v843_v13 = vpop.f32.mrf.mxu2 }
 0x259   : > { %v855_v14 = vmul.f32 %v853_v12, %v843_v13 }
 0x25b   : > { %856 = vst [vmem:[%s490_s11] sm:$0xff] %v855_v14 }
 0x25c   : > { %1462 = shalt.err (!%p1459_p0)
}
 0x25d   : > { %1190 = dma.vmem_to_hbm [thread:$0]  (%p1664_p2), %s871_s12, 128, %s873_s14, %s858_s17  }
 0x260   : > { %v845_v15 = vpop.f32.mrf.mxu2 }
 0x261 PF: > { %s884_s1 = sand.u32 1, %s1509_s21   ;;  %p1210_p5 = pnand %p1029_p3, %p1668_p4 }
 0x262   : > { %s885_s3 = scalar_lea.sflag [#allocation7], %s884_s1 }
 0x263   : > { %p1211_p6 = pneg %p1210_p5 }
 0x265   : > { %1504 = dma.done.wait (%p1211_p6), %s885_s3, 128  }
 0x266   : > { %1506 = vsyncadd (%p1211_p6), %s885_s3, 4294967168  ;;  %s23_s26 = sadd.s32 1, %s1529_s26   ;;  %s1802_s27 = sld [smem:[#allocation19_spill]] }
 0x267   : > { %p20_p1 = scmp.ge.s32.totalorder %s23_s26, 4   ;;  %s1803_s23 = sld [smem:[#allocation22_spill]] }
 0x268   : > { %s1804_s24 = sld [smem:[#allocation20_spill]]  ;;  %s1806_s21 = smov %s1513_s22 }
 0x269   : > { %s1805_s25 = sld [smem:[#allocation21_spill]]  ;;  %22 = sbr.rel (!%p20_p1) target bundleno = 11 (0xb), region = 127 }
 0x26c   : > { %s1807_s22 = smov %s1802_s27 }
 0x26e   :  { %891 = vsyncpa [#allocation6], 1 }
 0x26f   :  { %893 = vsyncpa [#allocation6 + $0x1], 1 }
 0x270   :  { %894 = vsyncpa [#allocation9], 1 }
 0x271   :  { %895 = vsyncpa [#allocation7], 1 }
 0x272   :  { %897 = vsyncpa [#allocation7 + $0x1], 1 }

</bundles_post_ra>
